<compile_context>
chip_gen: v6e
topology: v6e:2x2x1
jax: 0.10.0
libtpu: 0.0.40
codegen_flags: <defaults>
</compile_context>

<pallas_src>
import math
from functools import partial

import jax
import jax.numpy as jnp
from jax import lax
from jax.experimental import pallas as pl
from jax.experimental.pallas import tpu as pltpu


# ---------------------------------------------------------------------------
# Helpers
# ---------------------------------------------------------------------------
def _rmsnorm(x, g_f32, eps):
    """PyTorch RMSNorm: norm in f32, cast back to x.dtype, then * weight."""
    xf = x.astype(jnp.float32)
    ms = jnp.mean(xf * xf, axis=-1, keepdims=True)
    xn = xf * lax.rsqrt(ms + eps)
    return xn.astype(x.dtype) * g_f32


def _round_up(x, m):
    return (x + m - 1) // m * m


def _sublanes(dtype):
    # native sublane count: 8 for 4-byte, 16 for 2-byte, 32 for 1-byte dtypes
    return 8 * max(1, 4 // jnp.dtype(dtype).itemsize)


def _pick_tile(total, target, align):
    """Largest divisor of `total` that is a multiple of `align` and <= target."""
    if total % align != 0:
        return total
    t = min((target // align) * align, total)
    while t >= align:
        if total % t == 0:
            return t
        t -= align
    return total


def _pick_batch_block(batch, seq, target_m=256):
    """Divisor of batch s.t. bb*seq ~ target_m while keeping >= 2 grid steps."""
    best = 1
    for cand in range(1, batch + 1):
        if batch % cand == 0 and cand * seq <= target_m:
            best = cand
    while best > 1 and batch // best < 2:
        best -= 1
        while batch % best:
            best -= 1
    return best


def _const_spec(shape):
    """Grid-constant block: same block every step -> single-buffer it."""
    idx = lambda *_: (0,) * len(shape)
    try:
        return pl.BlockSpec(shape, idx, pipeline_mode=pl.Buffered(1))
    except Exception:  # older jax without pipeline_mode / Buffered
        return pl.BlockSpec(shape, idx)


def _vmem_limit_bytes():
    cap = 64 * 1024 * 1024  # conservative fallback (v7x physical)
    try:
        cap = int(pltpu.get_tpu_info().vmem_capacity_bytes)
    except Exception:
        pass
    # 3/4 of physical leaves headroom for Mosaic internal scratch; cap at 96 MiB.
    return min((cap * 3) // 4, 96 * 1024 * 1024)


_VMEM_LIMIT = _vmem_limit_bytes()


# ---------------------------------------------------------------------------
# Attention sub-block kernel:  out = x + Wo(MHA(RMSNorm(x)))   (per batch block)
# ---------------------------------------------------------------------------
def _attn_block_kernel(x_ref, mask_ref, g_ref, wqkv_ref, bqkv_ref, wo_ref, bo_ref,
                       o_ref, *, n_heads, eps):
    # x_ref: (bb, seq, dim); mask_ref: (bb, 1, seq) {0,1}
    # wqkv_ref: (dim, 3*dim) [in,out]; wo_ref: (dim, dim) [in,out]
    x = x_ref[...]
    bb, seq, dim = x.shape
    head_dim = dim // n_heads
    scale = 1.0 / math.sqrt(head_dim)
    cdt = x.dtype  # MXU operand dtype follows the model dtype (bf16 stays bf16)

    x2d = x.reshape(bb * seq, dim)
    xn = _rmsnorm(x2d, g_ref[...].astype(jnp.float32), eps).astype(cdt)

    # Fused QKV projection: one MXU pass with N = 3*dim.
    qkv = jnp.dot(xn, wqkv_ref[...], preferred_element_type=jnp.float32) + bqkv_ref[...]
    q = qkv[:, 0 * dim:1 * dim].reshape(bb, seq, dim).astype(cdt)
    k = qkv[:, 1 * dim:2 * dim].reshape(bb, seq, dim).astype(cdt)
    v = qkv[:, 2 * dim:3 * dim].reshape(bb, seq, dim).astype(cdt)

    mask = mask_ref[...]  # (bb, 1, seq) key-padding mask, broadcast over query rows

    av_heads = []
    # Static unroll over heads (small n_heads); head slices are 128-lane aligned.
    # TODO(synk): switch to fori_loop + VMEM scratch for very large n_heads to bound
    # vreg live ranges.
    for h in range(n_heads):
        sl = slice(h * head_dim, (h + 1) * head_dim)
        q_h, k_h, v_h = q[:, :, sl], k[:, :, sl], v[:, :, sl]

        s = jnp.einsum('bqd,bkd->bqk', q_h, k_h,
                       preferred_element_type=jnp.float32) * scale
        s = jnp.where(mask == 0, -1e9, s)               # masked_fill(mask==0, -1e9)
        s = s - jnp.max(s, axis=-1, keepdims=True)
        p = jnp.exp(s)
        p = p * pl.reciprocal(jnp.sum(p, axis=-1, keepdims=True), approx=True)
        # TODO(synk): attention-weight dropout (training mode) not implemented (eval).

        av_heads.append(jnp.einsum('bqk,bkd->bqd', p.astype(cdt), v_h,
                                   preferred_element_type=jnp.float32))

    # Single K=dim output projection after the head loop (no per-head Wo folding).
    av = jnp.concatenate(av_heads, axis=-1).reshape(bb * seq, dim).astype(cdt)
    out = jnp.dot(av, wo_ref[...], preferred_element_type=jnp.float32) + bo_ref[...]

    # residual (attention_dropout is identity in eval mode)
    o_ref[...] = (x2d.astype(jnp.float32) + out).reshape(bb, seq, dim).astype(o_ref.dtype)


def attention_block(x, e_mask, g, wqkv_t, bqkv, wo_t, bo, *, n_heads, eps):
    batch, seq, dim = x.shape
    mask = e_mask.reshape(batch, 1, seq).astype(jnp.int32)
    bb = _pick_batch_block(batch, seq)
    kern = partial(_attn_block_kernel, n_heads=n_heads, eps=eps)

    return pl.pallas_call(
        kern,
        out_shape=jax.ShapeDtypeStruct((batch, seq, dim), x.dtype),
        grid_spec=pltpu.PrefetchScalarGridSpec(
            num_scalar_prefetch=0,
            grid=(batch // bb,),
            in_specs=[
                pl.BlockSpec((bb, seq, dim), lambda b: (b, 0, 0)),   # x
                pl.BlockSpec((bb, 1, seq), lambda b: (b, 0, 0)),     # mask
                _const_spec((1, dim)),                               # rmsnorm gamma
                _const_spec((dim, 3 * dim)),                         # fused Wqkv^T
                _const_spec((1, 3 * dim)),                           # fused bqkv
                _const_spec((dim, dim)),                             # Wo^T
                _const_spec((1, dim)),                               # bo
            ],
            out_specs=pl.BlockSpec((bb, seq, dim), lambda b: (b, 0, 0)),
        ),
        compiler_params=pltpu.CompilerParams(
            dimension_semantics=("parallel",),
            vmem_limit_bytes=_VMEM_LIMIT),
    )(x, mask, g.reshape(1, dim), wqkv_t, bqkv, wo_t, bo.reshape(1, dim))


# ---------------------------------------------------------------------------
# FFN sub-block kernel:  out = x + W2(relu(W1(RMSNorm(x)) + b1)) + b2
# grid = (token tiles, hidden tiles);  hidden axis accumulates into f32 scratch.
# ---------------------------------------------------------------------------
def _ffn_block_kernel(x_ref, g_ref, w1_ref, b1_ref, w2_ref, b2_ref, o_ref,
                      acc_ref, xn_ref, *, eps):
    # x_ref: (tm, dim); w1_ref: (dim, th) [in,out]; w2_ref: (th, dim) [in,out]
    k = pl.program_id(1)

    @pl.when(k == 0)
    def _():
        xn_ref[...] = _rmsnorm(x_ref[...], g_ref[...].astype(jnp.float32),
                               eps).astype(xn_ref.dtype)
        acc_ref[...] = jnp.zeros_like(acc_ref)

    h = jnp.dot(xn_ref[...], w1_ref[...], preferred_element_type=jnp.float32)
    h = jnp.maximum(h + b1_ref[...], 0.0)
    # TODO(synk): dropout between the two linears (training mode) not implemented (eval).
    acc_ref[...] += jnp.dot(h.astype(w2_ref.dtype), w2_ref[...],
                            preferred_element_type=jnp.float32)

    @pl.when(k == pl.num_programs(1) - 1)
    def _():
        y = acc_ref[...] + b2_ref[...]
        # residual (feed_forward_dropout is identity in eval mode)
        o_ref[...] = (x_ref[...].astype(jnp.float32) + y).astype(o_ref.dtype)


def ffn_block(x, g, w1_t, b1, w2_t, b2, *, eps, tm=256, th=256):
    batch, seq, dim = x.shape
    hidden = w1_t.shape[1]
    n_tok = batch * seq

    sub = _sublanes(x.dtype)
    tm = min(tm, _round_up(n_tok, sub))
    if pl.cdiv(n_tok, tm) < 2 and n_tok > sub:
        tm = _round_up(pl.cdiv(n_tok, 2), sub)   # >= 2 token tiles for v7x megacore
    n_pad = _round_up(n_tok, tm)
    th = _pick_tile(hidden, th, 128)             # hidden-dim tile (multiple of 128)

    x2d = x.reshape(n_tok, dim)
    if n_pad != n_tok:
        x2d = jnp.pad(x2d, ((0, n_pad - n_tok), (0, 0)))

    kern = partial(_ffn_block_kernel, eps=eps)
    out2d = pl.pallas_call(
        kern,
        out_shape=jax.ShapeDtypeStruct((n_pad, dim), x.dtype),
        grid_spec=pltpu.PrefetchScalarGridSpec(
            num_scalar_prefetch=0,
            grid=(n_pad // tm, hidden // th),
            in_specs=[
                pl.BlockSpec((tm, dim), lambda i, k: (i, 0)),   # x (resident across k)
                _const_spec((1, dim)),                          # rmsnorm gamma
                pl.BlockSpec((dim, th), lambda i, k: (0, k)),   # W1^T hidden tile
                pl.BlockSpec((1, th), lambda i, k: (0, k)),     # b1 tile
                pl.BlockSpec((th, dim), lambda i, k: (k, 0)),   # W2^T hidden tile
                _const_spec((1, dim)),                          # b2
            ],
            out_specs=pl.BlockSpec((tm, dim), lambda i, k: (i, 0)),
            scratch_shapes=[pltpu.VMEM((tm, dim), jnp.float32),   # accumulator
                            pltpu.VMEM((tm, dim), x.dtype)],      # cached RMSNorm(x)
        ),
        compiler_params=pltpu.CompilerParams(
            dimension_semantics=("parallel", "arbitrary"),
            vmem_limit_bytes=_VMEM_LIMIT),
    )(x2d, g.reshape(1, dim), w1_t, b1.reshape(1, hidden), w2_t, b2.reshape(1, dim))

    return out2d[:n_tok].reshape(batch, seq, dim)


# ---------------------------------------------------------------------------
# Full EncoderBlock forward
# ---------------------------------------------------------------------------
def encoder_block(x, e_mask, p, *, n_heads, eps):
    dim = x.shape[-1]
    # One-time (wrapper / XLA side) weight fusion + transpose to [in, out].
    wqkv_t = jnp.concatenate([p["wq"], p["wk"], p["wv"]], axis=0).T   # (dim, 3*dim)
    bqkv = jnp.concatenate([p["bq"], p["bk"], p["bv"]], axis=0).reshape(1, 3 * dim)
    wo_t = p["wo"].T                                                  # (dim, dim)
    x = attention_block(x, e_mask, p["g_attn"], wqkv_t, bqkv, wo_t, p["bo"],
                        n_heads=n_heads, eps=eps)
    x = ffn_block(x, p["g_ffn"], p["w1"].T, p["b1"], p["w2"].T, p["b2"], eps=eps)
    return x


# ---------------------------------------------------------------------------
# Parameter init (mimics nn.Linear defaults) and pure-JAX reference
# ---------------------------------------------------------------------------
def init_params(key, dim, hidden_dim, dtype=jnp.float32):
    ks = jax.random.split(key, 14)

    def linear(kw, kb, out_d, in_d):
        bound = 1.0 / math.sqrt(in_d)
        w = jax.random.uniform(kw, (out_d, in_d), dtype, -bound, bound)
        b = jax.random.uniform(kb, (out_d,), dtype, -bound, bound)
        return w, b

    wq, bq = linear(ks[0], ks[1], dim, dim)
    wk, bk = linear(ks[2], ks[3], dim, dim)
    wv, bv = linear(ks[4], ks[5], dim, dim)
    wo, bo = linear(ks[6], ks[7], dim, dim)
    w1, b1 = linear(ks[8], ks[9], hidden_dim, dim)
    w2, b2 = linear(ks[10], ks[11], dim, hidden_dim)
    g_attn = 1.0 + 0.1 * jax.random.uniform(ks[12], (dim,), dtype, -1.0, 1.0)
    g_ffn = 1.0 + 0.1 * jax.random.uniform(ks[13], (dim,), dtype, -1.0, 1.0)
    return dict(g_attn=g_attn, wq=wq, bq=bq, wk=wk, bk=bk, wv=wv, bv=bv,
                wo=wo, bo=bo, g_ffn=g_ffn, w1=w1, b1=b1, w2=w2, b2=b2)


def encoder_block_ref(x, e_mask, p, *, n_heads, eps):
    def rmsnorm(v, g):
        vf = v.astype(jnp.float32)
        ms = jnp.mean(vf * vf, axis=-1, keepdims=True)
        return (vf * jax.lax.rsqrt(ms + eps)).astype(v.dtype) * g

    b, s, d = x.shape
    hd = d // n_heads
    with jax.default_matmul_precision("highest"):
        xn = rmsnorm(x, p["g_attn"])
        q = xn @ p["wq"].T + p["bq"]
        k = xn @ p["wk"].T + p["bk"]
        v = xn @ p["wv"].T + p["bv"]
        qh = q.reshape(b, s, n_heads, hd).transpose(0, 2, 1, 3)
        kh = k.reshape(b, s, n_heads, hd).transpose(0, 2, 1, 3)
        vh = v.reshape(b, s, n_heads, hd).transpose(0, 2, 1, 3)
        scores = jnp.einsum("bhqe,bhke->bhqk", qh, kh) / math.sqrt(hd)
        scores = jnp.where(e_mask[:, :, None, :] == 0, -1e9, scores)
        attn = jax.nn.softmax(scores, axis=-1)
        av = jnp.einsum("bhqk,bhke->bhqe", attn, vh)
        cat = av.transpose(0, 2, 1, 3).reshape(b, s, d)
        x = x + cat @ p["wo"].T + p["bo"]
        xn = rmsnorm(x, p["g_ffn"])
        h = jnp.maximum(xn @ p["w1"].T + p["b1"], 0.0)
        x = x + h @ p["w2"].T + p["b2"]
    return x


if __name__ == "__main__":
    # Small ModelConfig-equivalent shapes (lane-aligned): dim=256, n_heads=2
    # (head_dim=128), hidden_dim=512, batch=2, seq=8, norm_eps=1e-5. Eval mode.
    batch, seq, dim, n_heads, hidden_dim = 2, 8, 256, 2, 512
    eps = 1e-5

    key = jax.random.PRNGKey(0)
    kx, kp = jax.random.split(key)
    x = jax.random.normal(kx, (batch, seq, dim), jnp.float32)
    params = init_params(kp, dim, hidden_dim)

    # Key-padding mask (1 = keep, 0 = masked); batch 1 has its last two positions padded.
    e_mask = jnp.ones((batch, 1, seq), jnp.int32).at[1, 0, seq - 2:].set(0)

    out = encoder_block(x, e_mask, params, n_heads=n_heads, eps=eps)
    out = jax.block_until_ready(out)

    ref = encoder_block_ref(x, e_mask, params, n_heads=n_heads, eps=eps)
    assert out.shape == (batch, seq, dim)
    max_err = float(jnp.max(jnp.abs(out - ref)))
    assert jnp.allclose(out, ref, atol=2e-3, rtol=2e-3), f"mismatch vs reference: {max_err}"

    print("KERNEL_OK")
</pallas_src>

<mosaic_0001>
module attributes {stable_mosaic.version = 11 : i64} {
  func.func @_attn_block_kernel(%arg0: i32, %arg1: memref<1x8x256xf32, #tpu.memory_space<vmem>>, %arg2: memref<1x1x8xi32, #tpu.memory_space<vmem>>, %arg3: memref<1x256xf32, #tpu.memory_space<vmem>>, %arg4: memref<256x768xf32, #tpu.memory_space<vmem>>, %arg5: memref<1x768xf32, #tpu.memory_space<vmem>>, %arg6: memref<256x256xf32, #tpu.memory_space<vmem>>, %arg7: memref<1x256xf32, #tpu.memory_space<vmem>>, %arg8: memref<1x8x256xf32, #tpu.memory_space<vmem>>) attributes {dimension_semantics = [#tpu.dimension_semantics<parallel>], iteration_bounds = array<i64: 2>, scalar_prefetch = 0 : i64, scratch_operands = 0 : i64, tpu.core_type = #tpu.core_type<tc>, window_params = [{transform_indices = @transform_0, window_bounds = array<i64: 1, 8, 256>}, {transform_indices = @transform_1, window_bounds = array<i64: 1, 1, 8>}, {pipeline_mode = #tpu.pipeline_mode<synchronous>, transform_indices = @transform_2, window_bounds = array<i64: 1, 256>}, {pipeline_mode = #tpu.pipeline_mode<synchronous>, transform_indices = @transform_3, window_bounds = array<i64: 256, 768>}, {pipeline_mode = #tpu.pipeline_mode<synchronous>, transform_indices = @transform_4, window_bounds = array<i64: 1, 768>}, {pipeline_mode = #tpu.pipeline_mode<synchronous>, transform_indices = @transform_5, window_bounds = array<i64: 256, 256>}, {pipeline_mode = #tpu.pipeline_mode<synchronous>, transform_indices = @transform_6, window_bounds = array<i64: 1, 256>}, {transform_indices = @transform_7, window_bounds = array<i64: 1, 8, 256>}]} {
    %c0 = arith.constant 0 : index
    %c0_0 = arith.constant 0 : index
    %c0_1 = arith.constant 0 : index
    %0 = vector.load %arg1[%c0, %c0_0, %c0_1] : memref<1x8x256xf32, #tpu.memory_space<vmem>>, vector<1x8x256xf32>
    %1 = vector.shape_cast %0 : vector<1x8x256xf32> to vector<8x256xf32>
    %c0_2 = arith.constant 0 : index
    %c0_3 = arith.constant 0 : index
    %2 = vector.load %arg3[%c0_2, %c0_3] : memref<1x256xf32, #tpu.memory_space<vmem>>, vector<1x256xf32>
    %3 = arith.mulf %1, %1 : vector<8x256xf32>
    %cst = arith.constant dense<0.000000e+00> : vector<8xf32>
    %4 = vector.multi_reduction <add>, %3, %cst [1] : vector<8x256xf32> to vector<8xf32>
    %5 = vector.shape_cast %4 : vector<8xf32> to vector<8x1xf32>
    %cst_4 = arith.constant 2.560000e+02 : f32
    %6 = vector.broadcast %cst_4 : f32 to vector<8x1xf32>
    %7 = arith.divf %5, %6 : vector<8x1xf32>
    %cst_5 = arith.constant 9.99999974E-6 : f32
    %8 = vector.broadcast %cst_5 : f32 to vector<8x1xf32>
    %9 = arith.addf %7, %8 : vector<8x1xf32>
    %10 = math.rsqrt %9 : vector<8x1xf32>
    %11 = vector.broadcast %10 : vector<8x1xf32> to vector<8x256xf32>
    %12 = arith.mulf %1, %11 : vector<8x256xf32>
    %13 = vector.broadcast %2 : vector<1x256xf32> to vector<8x256xf32>
    %14 = arith.mulf %12, %13 : vector<8x256xf32>
    %c0_6 = arith.constant 0 : index
    %c0_7 = arith.constant 0 : index
    %15 = vector.load %arg4[%c0_6, %c0_7] : memref<256x768xf32, #tpu.memory_space<vmem>>, vector<256x768xf32>
    %cst_8 = arith.constant dense<0.000000e+00> : vector<8x768xf32>
    %16 = tpu.matmul %14, %15, %cst_8 {dimension_numbers = #tpu.dot_dimension_numbers<[1], [0], [0], [1], [0, 0, 1, 1], [], []>} : vector<8x256xf32>, vector<256x768xf32>, vector<8x768xf32> -> vector<8x768xf32>
    %c0_9 = arith.constant 0 : index
    %c0_10 = arith.constant 0 : index
    %17 = vector.load %arg5[%c0_9, %c0_10] : memref<1x768xf32, #tpu.memory_space<vmem>>, vector<1x768xf32>
    %18 = vector.broadcast %17 : vector<1x768xf32> to vector<8x768xf32>
    %19 = arith.addf %16, %18 : vector<8x768xf32>
    %20 = vector.extract_strided_slice %19 {offsets = [0, 0], sizes = [8, 256], strides = [1, 1]} : vector<8x768xf32> to vector<8x256xf32>
    %21 = vector.shape_cast %20 : vector<8x256xf32> to vector<1x8x256xf32>
    %22 = vector.extract_strided_slice %19 {offsets = [0, 256], sizes = [8, 256], strides = [1, 1]} : vector<8x768xf32> to vector<8x256xf32>
    %23 = vector.shape_cast %22 : vector<8x256xf32> to vector<1x8x256xf32>
    %24 = vector.extract_strided_slice %19 {offsets = [0, 512], sizes = [8, 256], strides = [1, 1]} : vector<8x768xf32> to vector<8x256xf32>
    %25 = vector.shape_cast %24 : vector<8x256xf32> to vector<1x8x256xf32>
    %c0_11 = arith.constant 0 : index
    %c0_12 = arith.constant 0 : index
    %c0_13 = arith.constant 0 : index
    %26 = vector.load %arg2[%c0_11, %c0_12, %c0_13] : memref<1x1x8xi32, #tpu.memory_space<vmem>>, vector<1x1x8xi32>
    %27 = vector.extract_strided_slice %21 {offsets = [0, 0, 0], sizes = [1, 8, 128], strides = [1, 1, 1]} : vector<1x8x256xf32> to vector<1x8x128xf32>
    %28 = vector.extract_strided_slice %23 {offsets = [0, 0, 0], sizes = [1, 8, 128], strides = [1, 1, 1]} : vector<1x8x256xf32> to vector<1x8x128xf32>
    %29 = vector.extract_strided_slice %25 {offsets = [0, 0, 0], sizes = [1, 8, 128], strides = [1, 1, 1]} : vector<1x8x256xf32> to vector<1x8x128xf32>
    "tpu.trace_start"() <{level = 10 : i32, message = "bqd,bkd->bqk"}> : () -> ()
    %cst_14 = arith.constant dense<0.000000e+00> : vector<1x8x8xf32>
    %30 = tpu.matmul %27, %28, %cst_14 {dimension_numbers = #tpu.dot_dimension_numbers<[2], [2], [1], [1], [0, 0, 0, 1, 1, 1], [0], [0]>} : vector<1x8x128xf32>, vector<1x8x128xf32>, vector<1x8x8xf32> -> vector<1x8x8xf32>
    "tpu.trace_stop"() : () -> ()
    %cst_15 = arith.constant 0.0883883461 : f32
    %31 = vector.broadcast %cst_15 : f32 to vector<1x8x8xf32>
    %32 = arith.mulf %30, %31 : vector<1x8x8xf32>
    %c0_i32 = arith.constant 0 : i32
    %33 = vector.broadcast %c0_i32 : i32 to vector<1x1x8xi32>
    %34 = arith.cmpi eq, %26, %33 : vector<1x1x8xi32>
    %cst_16 = arith.constant -1.000000e+09 : f32
    %35 = vector.shape_cast %34 : vector<1x1x8xi1> to vector<1x1x8xi1>
    %36 = vector.broadcast %35 : vector<1x1x8xi1> to vector<1x8x8xi1>
    %37 = vector.broadcast %cst_16 : f32 to vector<1x8x8xf32>
    %38 = arith.select %36, %37, %32 : vector<1x8x8xi1>, vector<1x8x8xf32>
    %cst_17 = arith.constant dense<0xFF800000> : vector<1x8xf32>
    %39 = vector.multi_reduction <maximumf>, %38, %cst_17 [2] : vector<1x8x8xf32> to vector<1x8xf32>
    %40 = vector.shape_cast %39 : vector<1x8xf32> to vector<1x8x1xf32>
    %41 = vector.broadcast %40 : vector<1x8x1xf32> to vector<1x8x8xf32>
    %42 = arith.subf %38, %41 : vector<1x8x8xf32>
    %43 = math.exp %42 : vector<1x8x8xf32>
    %cst_18 = arith.constant dense<0.000000e+00> : vector<1x8xf32>
    %44 = vector.multi_reduction <add>, %43, %cst_18 [2] : vector<1x8x8xf32> to vector<1x8xf32>
    %45 = vector.shape_cast %44 : vector<1x8xf32> to vector<1x8x1xf32>
    %46 = tpu.reciprocal %45 {approx = true} : vector<1x8x1xf32> -> vector<1x8x1xf32>
    %47 = vector.broadcast %46 : vector<1x8x1xf32> to vector<1x8x8xf32>
    %48 = arith.mulf %43, %47 : vector<1x8x8xf32>
    "tpu.trace_start"() <{level = 10 : i32, message = "bqk,bkd->bqd"}> : () -> ()
    %cst_19 = arith.constant dense<0.000000e+00> : vector<1x8x128xf32>
    %49 = tpu.matmul %48, %29, %cst_19 {dimension_numbers = #tpu.dot_dimension_numbers<[2], [1], [1], [2], [0, 0, 0, 1, 1, 2], [0], [0]>} : vector<1x8x8xf32>, vector<1x8x128xf32>, vector<1x8x128xf32> -> vector<1x8x128xf32>
    "tpu.trace_stop"() : () -> ()
    %50 = vector.extract_strided_slice %21 {offsets = [0, 0, 128], sizes = [1, 8, 128], strides = [1, 1, 1]} : vector<1x8x256xf32> to vector<1x8x128xf32>
    %51 = vector.extract_strided_slice %23 {offsets = [0, 0, 128], sizes = [1, 8, 128], strides = [1, 1, 1]} : vector<1x8x256xf32> to vector<1x8x128xf32>
    %52 = vector.extract_strided_slice %25 {offsets = [0, 0, 128], sizes = [1, 8, 128], strides = [1, 1, 1]} : vector<1x8x256xf32> to vector<1x8x128xf32>
    "tpu.trace_start"() <{level = 10 : i32, message = "bqd,bkd->bqk"}> : () -> ()
    %cst_20 = arith.constant dense<0.000000e+00> : vector<1x8x8xf32>
    %53 = tpu.matmul %50, %51, %cst_20 {dimension_numbers = #tpu.dot_dimension_numbers<[2], [2], [1], [1], [0, 0, 0, 1, 1, 1], [0], [0]>} : vector<1x8x128xf32>, vector<1x8x128xf32>, vector<1x8x8xf32> -> vector<1x8x8xf32>
    "tpu.trace_stop"() : () -> ()
    %cst_21 = arith.constant 0.0883883461 : f32
    %54 = vector.broadcast %cst_21 : f32 to vector<1x8x8xf32>
    %55 = arith.mulf %53, %54 : vector<1x8x8xf32>
    %c0_i32_22 = arith.constant 0 : i32
    %56 = vector.broadcast %c0_i32_22 : i32 to vector<1x1x8xi32>
    %57 = arith.cmpi eq, %26, %56 : vector<1x1x8xi32>
    %cst_23 = arith.constant -1.000000e+09 : f32
    %58 = vector.shape_cast %57 : vector<1x1x8xi1> to vector<1x1x8xi1>
    %59 = vector.broadcast %58 : vector<1x1x8xi1> to vector<1x8x8xi1>
    %60 = vector.broadcast %cst_23 : f32 to vector<1x8x8xf32>
    %61 = arith.select %59, %60, %55 : vector<1x8x8xi1>, vector<1x8x8xf32>
    %cst_24 = arith.constant dense<0xFF800000> : vector<1x8xf32>
    %62 = vector.multi_reduction <maximumf>, %61, %cst_24 [2] : vector<1x8x8xf32> to vector<1x8xf32>
    %63 = vector.shape_cast %62 : vector<1x8xf32> to vector<1x8x1xf32>
    %64 = vector.broadcast %63 : vector<1x8x1xf32> to vector<1x8x8xf32>
    %65 = arith.subf %61, %64 : vector<1x8x8xf32>
    %66 = math.exp %65 : vector<1x8x8xf32>
    %cst_25 = arith.constant dense<0.000000e+00> : vector<1x8xf32>
    %67 = vector.multi_reduction <add>, %66, %cst_25 [2] : vector<1x8x8xf32> to vector<1x8xf32>
    %68 = vector.shape_cast %67 : vector<1x8xf32> to vector<1x8x1xf32>
    %69 = tpu.reciprocal %68 {approx = true} : vector<1x8x1xf32> -> vector<1x8x1xf32>
    %70 = vector.broadcast %69 : vector<1x8x1xf32> to vector<1x8x8xf32>
    %71 = arith.mulf %66, %70 : vector<1x8x8xf32>
    "tpu.trace_start"() <{level = 10 : i32, message = "bqk,bkd->bqd"}> : () -> ()
    %cst_26 = arith.constant dense<0.000000e+00> : vector<1x8x128xf32>
    %72 = tpu.matmul %71, %52, %cst_26 {dimension_numbers = #tpu.dot_dimension_numbers<[2], [1], [1], [2], [0, 0, 0, 1, 1, 2], [0], [0]>} : vector<1x8x8xf32>, vector<1x8x128xf32>, vector<1x8x128xf32> -> vector<1x8x128xf32>
    "tpu.trace_stop"() : () -> ()
    %73 = tpu.concatenate %49, %72 in 2 : vector<1x8x128xf32>, vector<1x8x128xf32> -> vector<1x8x256xf32>
    %74 = vector.shape_cast %73 : vector<1x8x256xf32> to vector<8x256xf32>
    %c0_27 = arith.constant 0 : index
    %c0_28 = arith.constant 0 : index
    %75 = vector.load %arg6[%c0_27, %c0_28] : memref<256x256xf32, #tpu.memory_space<vmem>>, vector<256x256xf32>
    %cst_29 = arith.constant dense<0.000000e+00> : vector<8x256xf32>
    %76 = tpu.matmul %74, %75, %cst_29 {dimension_numbers = #tpu.dot_dimension_numbers<[1], [0], [0], [1], [0, 0, 1, 1], [], []>} : vector<8x256xf32>, vector<256x256xf32>, vector<8x256xf32> -> vector<8x256xf32>
    %c0_30 = arith.constant 0 : index
    %c0_31 = arith.constant 0 : index
    %77 = vector.load %arg7[%c0_30, %c0_31] : memref<1x256xf32, #tpu.memory_space<vmem>>, vector<1x256xf32>
    %78 = vector.broadcast %77 : vector<1x256xf32> to vector<8x256xf32>
    %79 = arith.addf %76, %78 : vector<8x256xf32>
    %80 = arith.addf %1, %79 : vector<8x256xf32>
    %81 = vector.shape_cast %80 : vector<8x256xf32> to vector<1x8x256xf32>
    %c0_32 = arith.constant 0 : index
    %c0_33 = arith.constant 0 : index
    %c0_34 = arith.constant 0 : index
    %82 = vector.load %arg8[%c0_32, %c0_33, %c0_34] : memref<1x8x256xf32, #tpu.memory_space<vmem>>, vector<1x8x256xf32>
    tpu.vector_store %arg8[%c0_32, %c0_33, %c0_34], %81 {strides = array<i32>} : memref<1x8x256xf32, #tpu.memory_space<vmem>>, vector<1x8x256xf32>,
    return
  }
  func.func @transform_0(%arg0: i32) -> (i32, i32, i32) {
    %c0_i32 = arith.constant 0 : i32
    %c0_i32_0 = arith.constant 0 : i32
    %c0_i32_1 = arith.constant 0 : i32
    return %arg0, %c0_i32, %c0_i32_0 : i32, i32, i32
  }
  func.func @transform_1(%arg0: i32) -> (i32, i32, i32) {
    %c0_i32 = arith.constant 0 : i32
    %c0_i32_0 = arith.constant 0 : i32
    %c0_i32_1 = arith.constant 0 : i32
    return %arg0, %c0_i32, %c0_i32_0 : i32, i32, i32
  }
  func.func @transform_2(%arg0: i32) -> (i32, i32) {
    %c0_i32 = arith.constant 0 : i32
    %c0_i32_0 = arith.constant 0 : i32
    %c0_i32_1 = arith.constant 0 : i32
    return %c0_i32, %c0_i32_0 : i32, i32
  }
  func.func @transform_3(%arg0: i32) -> (i32, i32) {
    %c0_i32 = arith.constant 0 : i32
    %c0_i32_0 = arith.constant 0 : i32
    %c0_i32_1 = arith.constant 0 : i32
    return %c0_i32, %c0_i32_0 : i32, i32
  }
  func.func @transform_4(%arg0: i32) -> (i32, i32) {
    %c0_i32 = arith.constant 0 : i32
    %c0_i32_0 = arith.constant 0 : i32
    %c0_i32_1 = arith.constant 0 : i32
    return %c0_i32, %c0_i32_0 : i32, i32
  }
  func.func @transform_5(%arg0: i32) -> (i32, i32) {
    %c0_i32 = arith.constant 0 : i32
    %c0_i32_0 = arith.constant 0 : i32
    %c0_i32_1 = arith.constant 0 : i32
    return %c0_i32, %c0_i32_0 : i32, i32
  }
  func.func @transform_6(%arg0: i32) -> (i32, i32) {
    %c0_i32 = arith.constant 0 : i32
    %c0_i32_0 = arith.constant 0 : i32
    %c0_i32_1 = arith.constant 0 : i32
    return %c0_i32, %c0_i32_0 : i32, i32
  }
  func.func @transform_7(%arg0: i32) -> (i32, i32, i32) {
    %c0_i32 = arith.constant 0 : i32
    %c0_i32_0 = arith.constant 0 : i32
    %c0_i32_1 = arith.constant 0 : i32
    return %arg0, %c0_i32, %c0_i32_0 : i32, i32, i32
  }
}

</mosaic_0001>

<bundles_post_ra>
// kernel: tpu_custom_call.1
= control target key start
LH: loop header
LB: loop body
LE: loop exit
PB: predicated region body
PF: predicated region fallthrough
CT: control target
= control target key end

     0   :  { %s2141_s0 = inlined_call_operand.hbm [shape: f32[2,8,256], index: 0, kind: input, shape index: {}]   ;;  %s2142_s1 = inlined_call_operand.hbm [shape: s32[2,1,8], index: 1, kind: input, shape index: {}]   ;;  %s2143_s2 = inlined_call_operand.hbm [shape: f32[1,256], index: 2, kind: input, shape index: {}]   ;;  %s2144_s3 = inlined_call_operand.hbm [shape: f32[256,768], index: 3, kind: input, shape index: {}]   ;;  %s2145_s4 = inlined_call_operand.vmem [shape: f32[1,768], index: 4, kind: input, shape index: {}]   ;;  %s2146_s5 = inlined_call_operand.hbm [shape: f32[256,256], index: 5, kind: input, shape index: {}]   ;;  %s2147_s6 = inlined_call_operand.vmem [shape: f32[1,256], index: 6, kind: input, shape index: {}]   ;;  %s2148_s7 = inlined_call_operand.hbm [shape: f32[2,8,256], index: 7, kind: output, shape index: {}]  }
   0x1   :  { %2153 = sst [smem:[#allocation17_spill]] %s2143_s2 }
   0x2   :  { %2154 = sst [smem:[#allocation18_spill]] %s2144_s3 }
   0x3   :  { %12 = vsyncpa [#allocation3], 0 }
   0x4   :  { %14 = vsyncpa [#allocation3 + $0x1], 0 }
   0x5   :  { %15 = vsyncpa [#allocation6], 0 }
   0x6   :  { %17 = vsyncpa [#allocation6 + $0x1], 0 }
   0x7   :  { %18 = vsyncpa [#allocation9], 0 }
   0x8   :  { %19 = vsyncpa [#allocation4], 0 }
   0x9   :  { %21 = vsyncpa [#allocation4 + $0x1], 0  ;;  %s1858_s24 = smov 0   ;;  %s1860_s25 = smov 0  }
   0xa   :  { %s1862_s26 = smov 0   ;;  %s1864_s27 = smov 0  }
   0xb LB: > { %s1879_s28 = sadd.s32 4294967295, %s1803_s27   ;;  %s1439_s29 = sadd.s32 4294967294, %s1803_s27   ;;  %s1803_s27 = sphi %s1864_s27, %s2177_s27   ;;  %s1799_s26 = sphi %s1862_s26, %s2176_s26   ;;  %s1795_s25 = sphi %s1860_s25, %s2175_s25   ;;  %s1791_s24 = sphi %s1858_s24, %s2174_s24  }
   0xc   : > { %p47_p0 = scmp.ne.s32.totalorder %s1795_s25, %s1791_s24  ;;  %p2149_p1 = scmp.eq.s32.totalorder %s1879_s28, 0 }
   0xd   : > { %p208_p3 = scmp.eq.s32.totalorder %s1439_s29, 1  ;;  %p1440_p5 = scmp.ge.s32.totalorder %s1803_s27, 1 }
   0xe   : > { %p1888_p4 = por %p2149_p1, %p47_p0  ;;  %p215_p7 = scmp.lt.s32.totalorder %s1803_s27, 3 }
   0xf   : > { %p1893_p6 = por %p208_p3, %p47_p0  ;;  %s1805_s10 = smov [#allocation7]  }
  0x10   : > { %s2155_s30 = scalar_select %p1888_p4, 1, 0 }
  0x11   : > { %s2156_s8 = scalar_select %p1893_p6, 1, 0 }
  0x12   : > { %p1898_p8 = pnand %p1440_p5, %p215_p7  ;;  %s228_s11 = sshll.u32 %s1805_s10, 4  ;;  %s229_s11 = int_to_ptr.vmem [resolvable:$true] %s228_s11 }
  0x13   : > { %s1806_s12 = smov [#allocation8]   ;;  %s1807_s15 = smov [#allocation10]  }
  0x14   : > { %s2157_s9 = scalar_select %p1898_p8, 1, 0 }
  0x15   : > { %p1510_p10 = pneg %p1898_p8  ;;  %s238_s13 = sshll.u32 %s1806_s12, 4  ;;  %s239_s13 = int_to_ptr.vmem [resolvable:$true] %s238_s13 }
  0x16   : > { %s254_s16 = sshll.u32 %s1807_s15, 4  ;;  %s1604_s17 = scalar_lea.vmem %s229_s11, 32  ;;  %s255_s16 = int_to_ptr.vmem [resolvable:$true] %s254_s16 }
  0x17   : > { %p1907_p11 = pnand %p1510_p10, %p2149_p1  ;;  %p1605_p13 = scmp.ne.s32.totalorder %s229_s11, %s1604_s17 }
  0x18   : > { %p1612_p5 = scmp.lt.s32.totalorder %s229_s11, %s229_s11  ;;  %p1613_p7 = scmp.lt.s32.totalorder %s1604_s17, %s1604_s17 }
  0x19   : > { %p1595_p12 = pneg %p1907_p11 }
  0x1a   : > { %p1614_p9 = por %p1613_p7, %p1612_p5 }
  0x1b   : > { %p1607_p0 = pnand %p1605_p13, %p1595_p12 }
  0x1d   : > { %p1608_p3 = pneg %p1607_p0 }
  0x1f   : > { %p1615_p10 = pnand %p1614_p9, %p1608_p3 }
  0x21   : > { %1618 = shalt.err (!%p1615_p10)
}
  0x22   : > { %s2159_s2 = sld [smem:[#allocation17_spill]]  ;;  %s1630_s20 = scalar_lea.vmem %s239_s13, 24576 }
  0x23   : > { %p1631_p1 = scmp.ne.s32.totalorder %s239_s13, %s1630_s20  ;;  %p1638_p13 = scmp.lt.s32.totalorder %s239_s13, %s239_s13 }
  0x24   : > { %p1639_p0 = scmp.lt.s32.totalorder %s1630_s20, %s1630_s20 }
  0x25   : > { %p1633_p2 = pnand %p1631_p1, %p1595_p12 }
  0x26   : > { %p1640_p4 = por %p1639_p0, %p1638_p13 }
  0x27   : > { %p1634_p6 = pneg %p1633_p2 }
  0x28   : > { %1513 = dma.hbm_to_vmem [thread:$0]  (!%p1907_p11), %s2159_s2, 32, %s229_s11, [#allocation6]  }
  0x29   : > { %p1641_p8 = pnand %p1640_p4, %p1634_p6 }
  0x2b   : > { %1644 = shalt.err (!%p1641_p8)
}
  0x2c   : > { %s1808_s21 = smov 768   ;;  %s1809_s22 = smov 48  }
  0x2d   : > { %s2160_s3 = sld [smem:[#allocation18_spill]]  ;;  %s1656_s10 = scalar_lea.vmem %s255_s16, 8192 }
  0x2e   : > { %p1657_p9 = scmp.ne.s32.totalorder %s255_s16, %s1656_s10  ;;  %p1664_p3 = scmp.lt.s32.totalorder %s255_s16, %s255_s16 }
  0x2f   : > { %p1665_p5 = scmp.lt.s32.totalorder %s1656_s10, %s1656_s10 }
  0x30   : > { %p1659_p1 = pnand %p1657_p9, %p1595_p12 }
  0x31   : > { %p1666_p4 = por %p1665_p5, %p1664_p3 }
  0x32   : > { %p1660_p2 = pneg %p1659_p1 }
  0x33   : > { %1516 = dma.hbm_to_vmem [thread:$0]  (!%p1907_p11), %s2160_s3, 24576, %s239_s13, [#allocation9], %s1808_s21, %s1808_s21, %s1809_s22  }
  0x34   : > { %p1667_p6 = pnand %p1666_p4, %p1660_p2 }
  0x36   : > { %1670 = shalt.err (!%p1667_p6)
}
  0x37   : > { %s1810_s11 = smov 256   ;;  %s1811_s12 = smov 16  }
  0x38   : > { %1519 = dma.hbm_to_vmem [thread:$0]  (!%p1907_p11), %s2146_s5, 8192, %s255_s16, [#allocation9], %s1810_s11, %s1810_s11, %s1811_s12  }
  0x39   : > { %s1938_s17 = sadd.s32 1, %s1803_s27   ;;  %s34_s19 = sadd.s32 1, %s1799_s26 }
  0x3a   : > { %s31_s18 = ssub.s32 %s1803_s27, %s1938_s17  ;;  %p41_p12 = scmp.ne.s32.totalorder %s1799_s26, %s1795_s25 }
  0x3b   : > { %p32_p8 = scmp.eq.s32.totalorder %s31_s18, 0  ;;  %p42_p7 = scmp.eq.s32.totalorder %s1803_s27, 0 }
  0x3c   : > { %p1534_p10 = scmp.lt.s32.totalorder %s1803_s27, 2  ;;  %p2161_p0 = scmp.eq.s32.totalorder %s1879_s28, 1 }
  0x3d   : > { %s1948_s20 = scalar_select %p32_p8, %s1799_s26, %s34_s19  }
  0x3e   : > { %p43_p13 = por %p42_p7, %p41_p12  ;;  %p1952_p9 = por %p2161_p0, %p41_p12 }
  0x3f   : > { %s1957_s21 = sand.u32 1, %s1799_s26   ;;  %s1462_s16 = sshll.u32 %s1803_s27, 8 }
  0x40   : > { %s2162_s14 = scalar_select %p1952_p9, 1, 0 }
  0x41   : > { %s1445_s22 = sshll.u32 %s1957_s21, 4  ;;  %s1964_s10 = scalar_lea.hbm %s2141_s0, %s1462_s16 }
  0x42   : > { %s275_s11 = scalar_lea.vmem [#allocation2], %s1445_s22  ;;  %p1966_p11 = pnand %p1534_p10, %p43_p13 }
  0x43   : > { %s283_s12 = sshll.u32 %s275_s11, 4  ;;  %s272_s18 = scalar_lea.sflag [#allocation3], %s1957_s21  ;;  %s284_s12 = int_to_ptr.vmem [resolvable:$true] %s283_s12 }
  0x44   : > { %s1671_s19 = scalar_lea.hbm %s1964_s10, 256  ;;  %p1673_p2 = pneg %p1966_p11 }
  0x45   : > { %p1672_p1 = scmp.ne.s32.totalorder %s1964_s10, %s1671_s19  ;;  %s1676_s23 = scalar_lea.hbm %s2141_s0, 512 }
  0x46   : > { %p1677_p4 = scmp.lt.s32.totalorder %s1964_s10, %s2141_s0  ;;  %p1678_p6 = scmp.lt.s32.totalorder %s1676_s23, %s1671_s19 }
  0x47   : > { %p1674_p3 = pnand %p1673_p2, %p1672_p1 }
  0x48   : > { %p1679_p8 = por %p1678_p6, %p1677_p4 }
  0x49   : > { %p1675_p5 = pneg %p1674_p3 }
  0x4b   : > { %p1680_p12 = pnand %p1679_p8, %p1675_p5 }
  0x4d   : > { %1683 = shalt.err (!%p1680_p12)
}
  0x4e   : > { %s1684_s15 = scalar_lea.vmem %s284_s12, 256  ;;  %s1812_s2 = smov [#allocation2]  }
  0x4f   : > { %p1685_p7 = scmp.ne.s32.totalorder %s284_s12, %s1684_s15  ;;  %s1689_s3 = sshll.u32 %s1812_s2, 4  ;;  %s1690_s3 = int_to_ptr.vmem [resolvable:$false] %s1689_s3 }
  0x50   : > { %s1691_s16 = scalar_lea.vmem %s1690_s3, 512  ;;  %p1692_p0 = scmp.lt.s32.totalorder %s284_s12, %s1690_s3 }
  0x51   : > { %p1687_p10 = pnand %p1685_p7, %p1673_p2  ;;  %p1693_p1 = scmp.lt.s32.totalorder %s1691_s16, %s1684_s15 }
  0x53   : > { %p1688_p13 = pneg %p1687_p10  ;;  %p1694_p3 = por %p1693_p1, %p1692_p0 }
  0x55   : > { %p1695_p9 = pnand %p1694_p3, %p1688_p13 }
  0x57   : > { %1698 = shalt.err (!%p1695_p9)
}
  0x58   : > { %1523 = dma.hbm_to_vmem [thread:$0]  (!%p1966_p11), %s1964_s10, 256, %s284_s12, %s272_s18  }
  0x59   : > { %s1448_s19 = sshll.u32 %s1803_s27, 4  ;;  %s293_s3 = scalar_lea.vmem [#allocation5], %s1957_s21 }
  0x5a   : > { %s1996_s2 = scalar_lea.hbm %s2142_s1, %s1448_s19  ;;  %s300_s15 = sshll.u32 %s293_s3, 4  ;;  %s301_s15 = int_to_ptr.vmem [resolvable:$true] %s300_s15 }
  0x5b   : > { %s2164_s29 = sand.u32 1, %s1803_s27   ;;  %s1699_s16 = scalar_lea.hbm %s1996_s2, 16 }
  0x5c   : > { %s291_s11 = scalar_lea.sflag [#allocation6], %s2164_s29  ;;  %p1700_p9 = scmp.ne.s32.totalorder %s1996_s2, %s1699_s16 }
  0x5d   : > { %s1704_s18 = scalar_lea.hbm %s2142_s1, 32  ;;  %p1705_p6 = scmp.lt.s32.totalorder %s1996_s2, %s2142_s1 }
  0x5e   : > { %p1702_p5 = pnand %p1700_p9, %p1673_p2  ;;  %p1706_p8 = scmp.lt.s32.totalorder %s1704_s18, %s1699_s16 }
  0x60   : > { %p1703_p4 = pneg %p1702_p5  ;;  %p1707_p12 = por %p1706_p8, %p1705_p6 }
  0x62   : > { %p1708_p7 = pnand %p1707_p12, %p1703_p4 }
  0x64   : > { %1711 = shalt.err (!%p1708_p7)
}
  0x65   : > { %s1712_s21 = scalar_lea.vmem %s301_s15, 16  ;;  %s1813_s23 = smov [#allocation5]  }
  0x66   : > { %p1713_p10 = scmp.ne.s32.totalorder %s301_s15, %s1712_s21  ;;  %s1717_s3 = sshll.u32 %s1813_s23, 4  ;;  %s1718_s3 = int_to_ptr.vmem [resolvable:$false] %s1717_s3 }
  0x67   : > { %s1719_s29 = scalar_lea.vmem %s1718_s3, 32  ;;  %p1720_p1 = scmp.lt.s32.totalorder %s301_s15, %s1718_s3 }
  0x68   : > { %p1715_p13 = pnand %p1713_p10, %p1673_p2  ;;  %p1721_p3 = scmp.lt.s32.totalorder %s1719_s29, %s1712_s21 }
  0x6a   : > { %p1716_p0 = pneg %p1715_p13  ;;  %p1722_p9 = por %p1721_p3, %p1720_p1 }
  0x6c   : > { %p1723_p5 = pnand %p1722_p9, %p1716_p0 }
  0x6e   : > { %1726 = shalt.err (!%p1723_p5)
}
  0x6f   : > { %1526 = dma.hbm_to_vmem [thread:$0]  (!%p1966_p11), %s1996_s2, 16, %s301_s15, %s291_s11  }
  0x70   : > { %p2165_p4 = scmp.ne.s32.totalorder %s2157_s9, 0 }
  0x71   : > { %s2022_s16 = sand.u32 (!%p2165_p4), 1, %s1795_s25   ;;  %p2166_p2 = scmp.ne.s32.totalorder (!%p2165_p4), %s2155_s30, 0 }
  0x72   : > { %309 = sbr.rel (%p2165_p4) target bundleno = 1410 (0x582), region = 48  ;;  %s1450_s10 = sshll.u32 (!%p2165_p4), %s2022_s16, 4 }
  0x73   : > { %s312_s12 = scalar_lea.sflag (!%p2165_p4), [#allocation3], %s2022_s16  ;;  %s2028_s18 = scalar_lea.vmem (!%p2165_p4), [#allocation2], %s1450_s10 }
  0x77   : > { %1770 = dma.done.wait (%p2166_p2), %s312_s12, 256  }
  0x78   : > { %1772 = vsyncadd (%p2166_p2), %s312_s12, 4294967040  ;;  %s320_s9 = sand.u32 1, %s1879_s28   ;;  %s323_s2 = scalar_lea.vmem [#allocation5], %s2022_s16 }
  0x79   : > { %s321_s13 = scalar_lea.sflag [#allocation6], %s320_s9 }
  0x7a   : > { %1774 = dma.done.wait (%p2166_p2), %s321_s13, 16  }
  0x7b   : > { %1776 = vsyncadd (%p2166_p2), %s321_s13, 4294967280  ;;  %p2167_p11 = scmp.eq.s32.totalorder %s1879_s28, 0 }
  0x7d   : > { %1778 = dma.done.wait (%p2167_p11), [#allocation6], 32   ;;  %p2168_p6 = pmov %p2167_p11 }
  0x7f   : > { %1780 = vsyncadd (%p2168_p6), [#allocation6], 4294967264  ;;  %p2169_p8 = pmov %p2168_p6 }
  0x80   : > { %p2170_p12 = pmov %p2168_p6 }
  0x81   : > { %1782 = dma.done.wait (%p2169_p8), [#allocation9], 32768  }
  0x82   : > { %1784 = vsyncadd (%p2170_p12), [#allocation9], 4294934528  ;;  %v2049_v0 = vld [vmem:[%s2028_s18] sm:$0xff]  ;;  %v2052_v1 = vld [vmem:[%s2028_s18 + $0x8] sm:$0xff]  ;;  %vm1815_vm0 = vmmov 0   ;;  %vm914_vm3 = vcmask 64512  }
  0x83   : > { %v488_v2 = vld [vmem:[#allocation8 + $0x2d8] sm:$0xff]  ;;  %v373_v3 = vmul.f32 %v2049_v0, %v2049_v0  ;;  %v374_v4 = vmul.f32 %v2052_v1, %v2052_v1  ;;  %v487_v5 = vld [vmem:[#allocation8 + $0x2d0] sm:$0xff]  ;;  %v490_v6 = vld [vmem:[#allocation8 + $0x2e8] sm:$0xff]  ;;  %s1463_s22 = sshll.u32 %s1879_s28, 8  ;;  %s369_s21 = scalar_lea.vmem [#allocation11], %s1450_s10 }
  0x84   : > { %621 = vmatprep.subr.mxu0 %v488_v2  ;;  %v482_v7 = vld [vmem:[#allocation8 + $0x2a8] sm:$0xff]  ;;  %692 = vmatprep.subr.mxu1 %v490_v6  ;;  %v489_v8 = vld [vmem:[#allocation8 + $0x2e0] sm:$0xff]  ;;  %v484_v10 = vld [vmem:[#allocation8 + $0x2b8] sm:$0xff]  ;;  %s1321_s23 = sshll.u32 %s369_s21, 4  ;;  %s1319_s12 = scalar_lea.hbm %s2148_s7, %s1463_s22  ;;  %s1322_s23 = int_to_ptr.vmem [resolvable:$true] %s1321_s23 }
  0x85   : > { %622 = vmatpush1.msra.mxu0 %v487_v5  ;;  %v481_v9 = vld [vmem:[#allocation8 + $0x2a0] sm:$0xff]  ;;  %v375_v11 = vadd.f32 %v374_v4, %v373_v3  ;;  %693 = vmatpush1.msra.mxu1 %v489_v8  ;;  %v476_v12 = vld [vmem:[#allocation8 + $0x278] sm:$0xff]  ;;  %v483_v13 = vld [vmem:[#allocation8 + $0x2b0] sm:$0xff]  ;;  %s1307_s9 = scalar_lea.sflag [#allocation4], %s2022_s16  ;;  %s1727_s13 = scalar_lea.vmem %s1322_s23, 256 }
  0x86   : > { %623 = vmatprep.subr.mxu0 %v482_v7  ;;  %v475_v14 = vld [vmem:[#allocation8 + $0x270] sm:$0xff]  ;;  %694 = vmatprep.subr.mxu1 %v484_v10  ;;  %v478_v15 = vld [vmem:[#allocation8 + $0x288] sm:$0xff]  ;;  %v477_v17 = vld [vmem:[#allocation8 + $0x280] sm:$0xff]  ;;  %p1728_p7 = scmp.ne.s32.totalorder %s1322_s23, %s1727_s13  ;;  %p2171_p10 = scmp.ne.s32.totalorder %s2162_s14, 0 }
  0x87   : > { %624 = vmatpush1.msra.mxu0 %v481_v9  ;;  %v470_v16 = vld [vmem:[#allocation8 + $0x248] sm:$0xff]  ;;  %376 = vadd.xlane.f32.xlu0 %v375_v11  ;;  %v469_v18 = vld [vmem:[#allocation8 + $0x240] sm:$0xff]  ;;  %v472_v19 = vld [vmem:[#allocation8 + $0x258] sm:$0xff]  ;;  %s1817_s28 = smov [#allocation11]  }
  0x88   : > { %625 = vmatprep.subr.mxu0 %v476_v12  ;;  %695 = vmatpush1.msra.mxu1 %v483_v13  ;;  %v464_v20 = vld [vmem:[#allocation8 + $0x218] sm:$0xff]  ;;  %v471_v21 = vld [vmem:[#allocation8 + $0x250] sm:$0xff]  ;;  %v466_v23 = vld [vmem:[#allocation8 + $0x228] sm:$0xff]  ;;  %p1729_p13 = pnand %p1728_p7, %p2171_p10  ;;  %s1731_s10 = sshll.u32 %s1817_s28, 4  ;;  %s1732_s10 = int_to_ptr.vmem [resolvable:$false] %s1731_s10 }
  0x89   : > { %626 = vmatpush1.msra.mxu0 %v475_v14  ;;  %696 = vmatprep.subr.mxu1 %v478_v15  ;;  %v463_v22 = vld [vmem:[#allocation8 + $0x210] sm:$0xff]  ;;  %v458_v24 = vld [vmem:[#allocation8 + $0x1e8] sm:$0xff]  ;;  %v465_v25 = vld [vmem:[#allocation8 + $0x220] sm:$0xff]  ;;  %p1734_p1 = scmp.lt.s32.totalorder %s1322_s23, %s1732_s10 }
  0x8a   : > { %627 = vmatprep.subr.mxu0 %v470_v16  ;;  %697 = vmatpush1.msra.mxu1 %v477_v17  ;;  %v457_v26 = vld [vmem:[#allocation8 + $0x1e0] sm:$0xff]  ;;  %v460_v27 = vld [vmem:[#allocation8 + $0x1f8] sm:$0xff]  ;;  %v459_v29 = vld [vmem:[#allocation8 + $0x1f0] sm:$0xff]  ;;  %p1730_p0 = pneg %p1729_p13 }
  0x8b   : > { %628 = vmatpush1.msra.mxu0 %v469_v18  ;;  %698 = vmatprep.subr.mxu1 %v472_v19  ;;  %v452_v28 = vld [vmem:[#allocation8 + $0x1b8] sm:$0xff]  ;;  %v451_v30 = vld [vmem:[#allocation8 + $0x1b0] sm:$0xff]  ;;  %v454_v31 = vld [vmem:[#allocation8 + $0x1c8] sm:$0xff] }
  0x8c   : > { %629 = vmatprep.subr.mxu0 %v464_v20  ;;  %699 = vmatpush1.msra.mxu1 %v471_v21  ;;  %v446_v32 = vld [vmem:[#allocation8 + $0x188] sm:$0xff]  ;;  %v453_v33 = vld [vmem:[#allocation8 + $0x1c0] sm:$0xff]  ;;  %v448_v35 = vld [vmem:[#allocation8 + $0x198] sm:$0xff] }
  0x8d   : > { %630 = vmatpush1.msra.mxu0 %v463_v22  ;;  %700 = vmatprep.subr.mxu1 %v466_v23  ;;  %v445_v34 = vld [vmem:[#allocation8 + $0x180] sm:$0xff]  ;;  %v440_v36 = vld [vmem:[#allocation8 + $0x158] sm:$0xff]  ;;  %v447_v37 = vld [vmem:[#allocation8 + $0x190] sm:$0xff] }
  0x8e   : > { %631 = vmatprep.subr.mxu0 %v458_v24  ;;  %701 = vmatpush1.msra.mxu1 %v465_v25  ;;  %v439_v38 = vld [vmem:[#allocation8 + $0x150] sm:$0xff]  ;;  %v442_v39 = vld [vmem:[#allocation8 + $0x168] sm:$0xff]  ;;  %v441_v41 = vld [vmem:[#allocation8 + $0x160] sm:$0xff] }
  0x8f   : > { %632 = vmatpush1.msra.mxu0 %v457_v26  ;;  %702 = vmatprep.subr.mxu1 %v460_v27  ;;  %v434_v40 = vld [vmem:[#allocation8 + $0x128] sm:$0xff]  ;;  %v433_v42 = vld [vmem:[#allocation8 + $0x120] sm:$0xff]  ;;  %v436_v43 = vld [vmem:[#allocation8 + $0x138] sm:$0xff] }
  0x90   : > { %633 = vmatprep.subr.mxu0 %v452_v28  ;;  %703 = vmatpush1.msra.mxu1 %v459_v29  ;;  %v428_v44 = vld [vmem:[#allocation8 + $0xf8] sm:$0xff]  ;;  %v435_v45 = vld [vmem:[#allocation8 + $0x130] sm:$0xff]  ;;  %v430_v47 = vld [vmem:[#allocation8 + $0x108] sm:$0xff] }
  0x91   : > { %634 = vmatpush1.msra.mxu0 %v451_v30  ;;  %704 = vmatprep.subr.mxu1 %v454_v31  ;;  %v427_v46 = vld [vmem:[#allocation8 + $0xf0] sm:$0xff]  ;;  %v422_v48 = vld [vmem:[#allocation8 + $0xc8] sm:$0xff]  ;;  %v429_v49 = vld [vmem:[#allocation8 + $0x100] sm:$0xff] }
  0x92   : > { %635 = vmatprep.subr.mxu0 %v446_v32  ;;  %705 = vmatpush1.msra.mxu1 %v453_v33  ;;  %v421_v50 = vld [vmem:[#allocation8 + $0xc0] sm:$0xff]  ;;  %v424_v51 = vld [vmem:[#allocation8 + $0xd8] sm:$0xff]  ;;  %v423_v53 = vld [vmem:[#allocation8 + $0xd0] sm:$0xff] }
  0x93   : > { %636 = vmatpush1.msra.mxu0 %v445_v34  ;;  %706 = vmatprep.subr.mxu1 %v448_v35  ;;  %v416_v52 = vld [vmem:[#allocation8 + $0x98] sm:$0xff]  ;;  %v415_v54 = vld [vmem:[#allocation8 + $0x90] sm:$0xff]  ;;  %v418_v55 = vld [vmem:[#allocation8 + $0xa8] sm:$0xff] }
  0x94   : > { %637 = vmatprep.subr.mxu0 %v440_v36  ;;  %707 = vmatpush1.msra.mxu1 %v447_v37  ;;  %v410_v56 = vld [vmem:[#allocation8 + $0x68] sm:$0xff]  ;;  %v417_v57 = vld [vmem:[#allocation8 + $0xa0] sm:$0xff]  ;;  %v412_v59 = vld [vmem:[#allocation8 + $0x78] sm:$0xff] }
  0x95   : > { %638 = vmatpush1.msra.mxu0 %v439_v38  ;;  %708 = vmatprep.subr.mxu1 %v442_v39  ;;  %v409_v58 = vld [vmem:[#allocation8 + $0x60] sm:$0xff]  ;;  %v404_v60 = vld [vmem:[#allocation8 + $0x38] sm:$0xff]  ;;  %v411_v61 = vld [vmem:[#allocation8 + $0x70] sm:$0xff] }
  0x96   : > { %639 = vmatprep.subr.mxu0 %v434_v40  ;;  %709 = vmatpush1.msra.mxu1 %v441_v41  ;;  %v403_v62 = vld [vmem:[#allocation8 + $0x30] sm:$0xff]  ;;  %v406_v63 = vld [vmem:[#allocation8 + $0x48] sm:$0xff]  ;;  %v405_v3 = vld [vmem:[#allocation8 + $0x40] sm:$0xff] }
  0x97   : > { %640 = vmatpush1.msra.mxu0 %v433_v42  ;;  %710 = vmatprep.subr.mxu1 %v436_v43  ;;  %v398_v2 = vld [vmem:[#allocation8 + $0x8] sm:$0xff]  ;;  %v397_v4 = vld [vmem:[#allocation8] sm:$0xff]  ;;  %v400_v5 = vld [vmem:[#allocation8 + $0x18] sm:$0xff] }
  0x98   : > { %641 = vmatprep.subr.mxu0 %v428_v44  ;;  %711 = vmatpush1.msra.mxu1 %v435_v45  ;;  %v584_v6 = vld [vmem:[#allocation8 + $0x5d8] sm:$0xff]  ;;  %v399_v7 = vld [vmem:[#allocation8 + $0x10] sm:$0xff]  ;;  %v586_v9 = vld [vmem:[#allocation8 + $0x5e8] sm:$0xff] }
  0x99   : > { %642 = vmatpush1.msra.mxu0 %v427_v46  ;;  %712 = vmatprep.subr.mxu1 %v430_v47  ;;  %v583_v8 = vld [vmem:[#allocation8 + $0x5d0] sm:$0xff]  ;;  %v578_v10 = vld [vmem:[#allocation8 + $0x5a8] sm:$0xff]  ;;  %v585_v11 = vld [vmem:[#allocation8 + $0x5e0] sm:$0xff] }
  0x9a   : > { %643 = vmatprep.subr.mxu0 %v422_v48  ;;  %713 = vmatpush1.msra.mxu1 %v429_v49  ;;  %v577_v12 = vld [vmem:[#allocation8 + $0x5a0] sm:$0xff]  ;;  %v580_v13 = vld [vmem:[#allocation8 + $0x5b8] sm:$0xff]  ;;  %v579_v15 = vld [vmem:[#allocation8 + $0x5b0] sm:$0xff] }
  0x9b   : > { %644 = vmatpush1.msra.mxu0 %v421_v50  ;;  %714 = vmatprep.subr.mxu1 %v424_v51  ;;  %v572_v14 = vld [vmem:[#allocation8 + $0x578] sm:$0xff]  ;;  %v571_v16 = vld [vmem:[#allocation8 + $0x570] sm:$0xff]  ;;  %v574_v17 = vld [vmem:[#allocation8 + $0x588] sm:$0xff] }
  0x9c   : > { %645 = vmatprep.subr.mxu0 %v416_v52  ;;  %715 = vmatpush1.msra.mxu1 %v423_v53  ;;  %v566_v18 = vld [vmem:[#allocation8 + $0x548] sm:$0xff]  ;;  %v573_v19 = vld [vmem:[#allocation8 + $0x580] sm:$0xff]  ;;  %v568_v21 = vld [vmem:[#allocation8 + $0x558] sm:$0xff] }
  0x9d   : > { %646 = vmatpush1.msra.mxu0 %v415_v54  ;;  %716 = vmatprep.subr.mxu1 %v418_v55  ;;  %v565_v20 = vld [vmem:[#allocation8 + $0x540] sm:$0xff]  ;;  %v560_v22 = vld [vmem:[#allocation8 + $0x518] sm:$0xff]  ;;  %v567_v23 = vld [vmem:[#allocation8 + $0x550] sm:$0xff] }
  0x9e   : > { %647 = vmatprep.subr.mxu0 %v410_v56  ;;  %717 = vmatpush1.msra.mxu1 %v417_v57  ;;  %v559_v24 = vld [vmem:[#allocation8 + $0x510] sm:$0xff]  ;;  %v562_v25 = vld [vmem:[#allocation8 + $0x528] sm:$0xff]  ;;  %v561_v27 = vld [vmem:[#allocation8 + $0x520] sm:$0xff] }
  0x9f   : > { %648 = vmatpush1.msra.mxu0 %v409_v58  ;;  %718 = vmatprep.subr.mxu1 %v412_v59  ;;  %v554_v26 = vld [vmem:[#allocation8 + $0x4e8] sm:$0xff]  ;;  %v553_v28 = vld [vmem:[#allocation8 + $0x4e0] sm:$0xff]  ;;  %v556_v29 = vld [vmem:[#allocation8 + $0x4f8] sm:$0xff] }
  0xa0   : > { %649 = vmatprep.subr.mxu0 %v404_v60  ;;  %719 = vmatpush1.msra.mxu1 %v411_v61  ;;  %v548_v30 = vld [vmem:[#allocation8 + $0x4b8] sm:$0xff]  ;;  %v555_v31 = vld [vmem:[#allocation8 + $0x4f0] sm:$0xff]  ;;  %v550_v33 = vld [vmem:[#allocation8 + $0x4c8] sm:$0xff] }
  0xa1   : > { %650 = vmatpush1.msra.mxu0 %v403_v62  ;;  %720 = vmatprep.subr.mxu1 %v406_v63  ;;  %v547_v32 = vld [vmem:[#allocation8 + $0x4b0] sm:$0xff]  ;;  %v542_v34 = vld [vmem:[#allocation8 + $0x488] sm:$0xff]  ;;  %v549_v35 = vld [vmem:[#allocation8 + $0x4c0] sm:$0xff] }
  0xa2   : > { %651 = vmatprep.subr.mxu0 %v398_v2  ;;  %721 = vmatpush1.msra.mxu1 %v405_v3  ;;  %v541_v36 = vld [vmem:[#allocation8 + $0x480] sm:$0xff]  ;;  %v544_v37 = vld [vmem:[#allocation8 + $0x498] sm:$0xff]  ;;  %v543_v39 = vld [vmem:[#allocation8 + $0x490] sm:$0xff] }
  0xa3   : > { %652 = vmatpush1.msra.mxu0 %v397_v4  ;;  %722 = vmatprep.subr.mxu1 %v400_v5  ;;  %v536_v38 = vld [vmem:[#allocation8 + $0x458] sm:$0xff]  ;;  %v535_v40 = vld [vmem:[#allocation8 + $0x450] sm:$0xff]  ;;  %v538_v41 = vld [vmem:[#allocation8 + $0x468] sm:$0xff] }
  0xa4   : > { %653 = vmatprep.subr.mxu0 %v584_v6  ;;  %723 = vmatpush1.msra.mxu1 %v399_v7  ;;  %v530_v42 = vld [vmem:[#allocation8 + $0x428] sm:$0xff]  ;;  %v537_v43 = vld [vmem:[#allocation8 + $0x460] sm:$0xff]  ;;  %v532_v45 = vld [vmem:[#allocation8 + $0x438] sm:$0xff] }
  0xa5   : > { %654 = vmatpush2.msra.mxu0 %v583_v8  ;;  %724 = vmatprep.subr.mxu1 %v586_v9  ;;  %v529_v44 = vld [vmem:[#allocation8 + $0x420] sm:$0xff]  ;;  %v524_v46 = vld [vmem:[#allocation8 + $0x3f8] sm:$0xff]  ;;  %v531_v47 = vld [vmem:[#allocation8 + $0x430] sm:$0xff] }
  0xa6   : > { %655 = vmatprep.subr.mxu0 %v578_v10  ;;  %725 = vmatpush2.msra.mxu1 %v585_v11  ;;  %v523_v48 = vld [vmem:[#allocation8 + $0x3f0] sm:$0xff]  ;;  %v526_v49 = vld [vmem:[#allocation8 + $0x408] sm:$0xff]  ;;  %v525_v51 = vld [vmem:[#allocation8 + $0x400] sm:$0xff] }
  0xa7   : > { %656 = vmatpush2.msra.mxu0 %v577_v12  ;;  %726 = vmatprep.subr.mxu1 %v580_v13  ;;  %v518_v50 = vld [vmem:[#allocation8 + $0x3c8] sm:$0xff]  ;;  %v517_v52 = vld [vmem:[#allocation8 + $0x3c0] sm:$0xff]  ;;  %v520_v53 = vld [vmem:[#allocation8 + $0x3d8] sm:$0xff]  ;;  %v385_v13 = vlaneseq }
  0xa8   : > { %657 = vmatprep.subr.mxu0 %v572_v14  ;;  %727 = vmatpush2.msra.mxu1 %v579_v15  ;;  %v512_v54 = vld [vmem:[#allocation8 + $0x398] sm:$0xff]  ;;  %v519_v55 = vld [vmem:[#allocation8 + $0x3d0] sm:$0xff]  ;;  %v514_v57 = vld [vmem:[#allocation8 + $0x3a8] sm:$0xff] }
  0xa9   : > { %658 = vmatpush2.msra.mxu0 %v571_v16  ;;  %728 = vmatprep.subr.mxu1 %v574_v17  ;;  %v511_v56 = vld [vmem:[#allocation8 + $0x390] sm:$0xff]  ;;  %v506_v58 = vld [vmem:[#allocation8 + $0x368] sm:$0xff]  ;;  %v513_v59 = vld [vmem:[#allocation8 + $0x3a0] sm:$0xff]  ;;  %v2058_v14 = vshrl.u32 %v385_v13, 7 }
  0xaa   : > { %659 = vmatprep.subr.mxu0 %v566_v18  ;;  %729 = vmatpush2.msra.mxu1 %v573_v19  ;;  %v505_v60 = vld [vmem:[#allocation8 + $0x360] sm:$0xff]  ;;  %v508_v61 = vld [vmem:[#allocation8 + $0x378] sm:$0xff]  ;;  %v507_v63 = vld [vmem:[#allocation8 + $0x370] sm:$0xff] }
  0xab   : > { %660 = vmatpush2.msra.mxu0 %v565_v20  ;;  %730 = vmatprep.subr.mxu1 %v568_v21  ;;  %v500_v62 = vld [vmem:[#allocation8 + $0x338] sm:$0xff]  ;;  %v499_v2 = vld [vmem:[#allocation8 + $0x330] sm:$0xff]  ;;  %v502_v3 = vld [vmem:[#allocation8 + $0x348] sm:$0xff]  ;;  %v2061_v15 = vsub.s32 1, %v2058_v14  ;;  %v2064_v16 = vsub.s32 0, %v2058_v14 }
  0xac   : > { %661 = vmatprep.subr.mxu0 %v560_v22  ;;  %731 = vmatpush2.msra.mxu1 %v567_v23  ;;  %v494_v4 = vld [vmem:[#allocation8 + $0x308] sm:$0xff]  ;;  %v501_v5 = vld [vmem:[#allocation8 + $0x340] sm:$0xff]  ;;  %v496_v7 = vld [vmem:[#allocation8 + $0x318] sm:$0xff] }
  0xad   : > { %662 = vmatpush2.msra.mxu0 %v559_v24  ;;  %732 = vmatprep.subr.mxu1 %v562_v25  ;;  %v493_v6 = vld [vmem:[#allocation8 + $0x300] sm:$0xff]  ;;  %v492_v8 = vld [vmem:[#allocation8 + $0x2f8] sm:$0xff]  ;;  %v495_v9 = vld [vmem:[#allocation8 + $0x310] sm:$0xff] }
  0xae   : > { %663 = vmatprep.subr.mxu0 %v554_v26  ;;  %733 = vmatpush2.msra.mxu1 %v561_v27  ;;  %v372_v17 = vld [vmem:[#allocation7] sm:$0x3]  ;;  %v491_v25 = vld [vmem:[#allocation8 + $0x2f0] sm:$0xff]  ;;  %v486_v26 = vld [vmem:[#allocation8 + $0x2c8] sm:$0xff] }
  0xaf   : > { %664 = vmatpush2.msra.mxu0 %v553_v28  ;;  %734 = vmatprep.subr.mxu1 %v556_v29  ;;  %v392_v18 = vrot.slane %v372_v17, %v2061_v15  ;;  %v388_v19 = vrot.slane %v372_v17, %v2064_v16  ;;  %v485_v27 = vld [vmem:[#allocation8 + $0x2c0] sm:$0xff]  ;;  %v480_v28 = vld [vmem:[#allocation8 + $0x298] sm:$0xff]  ;;  %v479_v29 = vld [vmem:[#allocation8 + $0x290] sm:$0xff] }
  0xb0   : > { %665 = vmatprep.subr.mxu0 %v548_v30  ;;  %735 = vmatpush2.msra.mxu1 %v555_v31  ;;  %v468_v30 = vld [vmem:[#allocation8 + $0x238] sm:$0xff]  ;;  %v467_v31 = vld [vmem:[#allocation8 + $0x230] sm:$0xff]  ;;  %v522_v17 = vld [vmem:[#allocation8 + $0x3e8] sm:$0xff] }
  0xb1   : > { %666 = vmatpush2.msra.mxu0 %v547_v32  ;;  %736 = vmatprep.subr.mxu1 %v550_v33  ;;  %v462_v32 = vld [vmem:[#allocation8 + $0x208] sm:$0xff]  ;;  %v461_v33 = vld [vmem:[#allocation8 + $0x200] sm:$0xff]  ;;  %v527_v13 = vld [vmem:[#allocation8 + $0x410] sm:$0xff] }
  0xb2   : > { %667 = vmatprep.subr.mxu0 %v542_v34  ;;  %737 = vmatpush2.msra.mxu1 %v549_v35  ;;  %v456_v34 = vld [vmem:[#allocation8 + $0x1d8] sm:$0xff]  ;;  %v455_v35 = vld [vmem:[#allocation8 + $0x1d0] sm:$0xff] }
  0xb3   : > { %668 = vmatpush2.msra.mxu0 %v541_v36  ;;  %738 = vmatprep.subr.mxu1 %v544_v37  ;;  %v450_v36 = vld [vmem:[#allocation8 + $0x1a8] sm:$0xff]  ;;  %v449_v37 = vld [vmem:[#allocation8 + $0x1a0] sm:$0xff] }
  0xb4   : > { %669 = vmatprep.subr.mxu0 %v536_v38  ;;  %739 = vmatpush2.msra.mxu1 %v543_v39  ;;  %v444_v38 = vld [vmem:[#allocation8 + $0x178] sm:$0xff]  ;;  %v443_v39 = vld [vmem:[#allocation8 + $0x170] sm:$0xff] }
  0xb5   : > { %670 = vmatpush2.msra.mxu0 %v535_v40  ;;  %740 = vmatprep.subr.mxu1 %v538_v41  ;;  %v438_v40 = vld [vmem:[#allocation8 + $0x148] sm:$0xff]  ;;  %v437_v41 = vld [vmem:[#allocation8 + $0x140] sm:$0xff] }
  0xb6   : > { %671 = vmatprep.subr.mxu0 %v530_v42  ;;  %741 = vmatpush2.msra.mxu1 %v537_v43  ;;  %v432_v42 = vld [vmem:[#allocation8 + $0x118] sm:$0xff]  ;;  %v431_v43 = vld [vmem:[#allocation8 + $0x110] sm:$0xff] }
  0xb7   : > { %672 = vmatpush2.msra.mxu0 %v529_v44  ;;  %742 = vmatprep.subr.mxu1 %v532_v45  ;;  %v426_v44 = vld [vmem:[#allocation8 + $0xe8] sm:$0xff]  ;;  %v425_v45 = vld [vmem:[#allocation8 + $0xe0] sm:$0xff] }
  0xb8   : > { %673 = vmatprep.subr.mxu0 %v524_v46  ;;  %743 = vmatpush2.msra.mxu1 %v531_v47  ;;  %v420_v46 = vld [vmem:[#allocation8 + $0xb8] sm:$0xff]  ;;  %v419_v47 = vld [vmem:[#allocation8 + $0xb0] sm:$0xff] }
  0xb9   : > { %674 = vmatpush2.msra.mxu0 %v523_v48  ;;  %744 = vmatprep.subr.mxu1 %v526_v49  ;;  %v414_v48 = vld [vmem:[#allocation8 + $0x88] sm:$0xff]  ;;  %v413_v49 = vld [vmem:[#allocation8 + $0x80] sm:$0xff] }
  0xba   : > { %675 = vmatprep.subr.mxu0 %v518_v50  ;;  %745 = vmatpush2.msra.mxu1 %v525_v51  ;;  %v408_v50 = vld [vmem:[#allocation8 + $0x58] sm:$0xff]  ;;  %v407_v51 = vld [vmem:[#allocation8 + $0x50] sm:$0xff] }
  0xbb   : > { %676 = vmatpush2.msra.mxu0 %v517_v52  ;;  %746 = vmatprep.subr.mxu1 %v520_v53  ;;  %v402_v52 = vld [vmem:[#allocation8 + $0x28] sm:$0xff]  ;;  %v401_v53 = vld [vmem:[#allocation8 + $0x20] sm:$0xff] }
  0xbc   : > { %677 = vmatprep.subr.mxu0 %v512_v54  ;;  %747 = vmatpush2.msra.mxu1 %v519_v55  ;;  %v588_v54 = vld [vmem:[#allocation8 + $0x5f8] sm:$0xff]  ;;  %v587_v55 = vld [vmem:[#allocation8 + $0x5f0] sm:$0xff] }
  0xbd   : > { %678 = vmatpush2.msra.mxu0 %v511_v56  ;;  %748 = vmatprep.subr.mxu1 %v514_v57  ;;  %v582_v56 = vld [vmem:[#allocation8 + $0x5c8] sm:$0xff]  ;;  %v581_v57 = vld [vmem:[#allocation8 + $0x5c0] sm:$0xff] }
  0xbe   : > { %679 = vmatprep.subr.mxu0 %v506_v58  ;;  %749 = vmatpush2.msra.mxu1 %v513_v59  ;;  %v576_v58 = vld [vmem:[#allocation8 + $0x598] sm:$0xff]  ;;  %v575_v59 = vld [vmem:[#allocation8 + $0x590] sm:$0xff] }
  0xbf   : > { %680 = vmatpush2.msra.mxu0 %v505_v60  ;;  %750 = vmatprep.subr.mxu1 %v508_v61  ;;  %v570_v60 = vld [vmem:[#allocation8 + $0x568] sm:$0xff]  ;;  %v569_v61 = vld [vmem:[#allocation8 + $0x560] sm:$0xff] }
  0xc0   : > { %681 = vmatprep.subr.mxu0 %v500_v62  ;;  %751 = vmatpush2.msra.mxu1 %v507_v63  ;;  %v564_v62 = vld [vmem:[#allocation8 + $0x538] sm:$0xff]  ;;  %v563_v63 = vld [vmem:[#allocation8 + $0x530] sm:$0xff] }
  0xc1   : > { %682 = vmatpush2.msra.mxu0 %v499_v2  ;;  %752 = vmatprep.subr.mxu1 %v502_v3  ;;  %v558_v2 = vld [vmem:[#allocation8 + $0x508] sm:$0xff]  ;;  %v557_v3 = vld [vmem:[#allocation8 + $0x500] sm:$0xff] }
  0xc2   : > { %683 = vmatprep.subr.mxu0 %v494_v4  ;;  %753 = vmatpush2.msra.mxu1 %v501_v5  ;;  %v552_v4 = vld [vmem:[#allocation8 + $0x4d8] sm:$0xff]  ;;  %v551_v5 = vld [vmem:[#allocation8 + $0x4d0] sm:$0xff] }
  0xc3   : > { %684 = vmatpush2.msra.mxu0 %v493_v6  ;;  %754 = vmatprep.subr.mxu1 %v496_v7  ;;  %v546_v6 = vld [vmem:[#allocation8 + $0x4a8] sm:$0xff]  ;;  %v545_v7 = vld [vmem:[#allocation8 + $0x4a0] sm:$0xff] }
  0xc4   : > { %763 = vmatprep.subr.mxu0 %v492_v8  ;;  %755 = vmatpush2.msra.mxu1 %v495_v9  ;;  %v540_v8 = vld [vmem:[#allocation8 + $0x478] sm:$0xff]  ;;  %v539_v9 = vld [vmem:[#allocation8 + $0x470] sm:$0xff] }
 0x110   : > { %v377_v10 = vpop.xlane.xlu0 %376 }
 0x111   : > { %v379_v11 = vmul.f32 0.00390625, %v377_v10  ;;  %v534_v10 = vld [vmem:[#allocation8 + $0x448] sm:$0xff] }
 0x113   : > { %v380_v12 = vadd.f32 1e-05, %v379_v11  ;;  %v533_v11 = vld [vmem:[#allocation8 + $0x440] sm:$0xff] }
 0x115   : > { %1581 = vrsqrt.f32 %v380_v12  ;;  %v528_v12 = vld [vmem:[#allocation8 + $0x418] sm:$0xff] }
 0x122   : > { %v1582_v20 = vpop.eup %1581 }
 0x123   : > { %v383_v21 = vmul.f32 %v1582_v20, %v2052_v1  ;;  %v382_v22 = vmul.f32 %v1582_v20, %v2049_v0  ;;  %v474_v1 = vld [vmem:[#allocation8 + $0x268] sm:$0xff]  ;;  %v473_v0 = vld [vmem:[#allocation8 + $0x260] sm:$0xff]  ;;  %v515_v20 = vld [vmem:[#allocation8 + $0x3b0] sm:$0xff] }
 0x125   : > { %v396_v23 = vmul.f32 %v392_v18, %v383_v21  ;;  %v2070_v24 = vmul.f32 %v388_v19, %v382_v22  ;;  %v521_v18 = vld [vmem:[#allocation8 + $0x3e0] sm:$0xff]  ;;  %v516_v19 = vld [vmem:[#allocation8 + $0x3b8] sm:$0xff]  ;;  %v510_v21 = vld [vmem:[#allocation8 + $0x388] sm:$0xff] }
 0x126   : > { %v509_v22 = vld [vmem:[#allocation8 + $0x380] sm:$0xff] }
 0x127   : > { %685 = vmatprep.mubr.f32.mxu0 %v396_v23  ;;  %756 = vmatprep.mubr.f32.mxu1 %v396_v23 }
 0x128   : > { %686 = vmatmul.mubr.f32.vlgmr.msra.gmra.mxu0 %v2070_v24  ;;  %757 = vmatmul.mubr.f32.vlgmr.msra.gmra.mxu1 %v2070_v24 }
 0x129   : > { %764 = vmatpush1.msra.mxu0 %v491_v25  ;;  %827 = vmatprep.mubr.f32.mxu0 %v396_v23  ;;  %v504_v23 = vld [vmem:[#allocation8 + $0x358] sm:$0xff]  ;;  %v503_v25 = vld [vmem:[#allocation8 + $0x350] sm:$0xff] }
 0x12a   : > { %765 = vmatprep.subr.mxu0 %v486_v26  ;;  %v498_v26 = vld [vmem:[#allocation8 + $0x328] sm:$0xff] }
 0x12b   : > { %766 = vmatpush1.msra.mxu0 %v485_v27  ;;  %v497_v27 = vld [vmem:[#allocation8 + $0x320] sm:$0xff] }
 0x12c   : > { %767 = vmatprep.subr.mxu0 %v480_v28  ;;  %v1814_v28 = vmov 0.0  }
 0x12d   : > { %768 = vmatpush1.msra.mxu0 %v479_v29  ;;  %1482 = vmatprep.subr.mxu1 %v1814_v28  ;;  %v601_v29 = vsub.s32 2, %v2058_v14 }
 0x12e   : > { %769 = vmatprep.subr.mxu0 %v474_v1  ;;  %1484 = vmatprep.mubr.msk.f32.mxu1 %vm1815_vm0, %v1814_v28  ;;  %v589_v1 = vld [vmem:[%s2145_s4] sm:$0x3f] }
 0x12f   : > { %770 = vmatpush1.msra.mxu0 %v473_v0  ;;  %v605_v0 = vsub.s32 3, %v2058_v14 }
 0x130   : > { %771 = vmatprep.subr.mxu0 %v468_v30  ;;  %v602_v30 = vrot.slane %v589_v1, %v601_v29  ;;  %v1177_v29 = vld [vmem:[#allocation10 + $0xb0] sm:$0xff] }
 0x131   : > { %772 = vmatpush1.msra.mxu0 %v467_v31  ;;  %v606_v31 = vrot.slane %v589_v1, %v605_v0  ;;  %v1175_v0 = vld [vmem:[#allocation10 + $0xa0] sm:$0xff] }
 0x132   : > { %773 = vmatprep.subr.mxu0 %v462_v32 }
 0x133   : > { %774 = vmatpush1.msra.mxu0 %v461_v33 }
 0x134   : > { %775 = vmatprep.subr.mxu0 %v456_v34 }
 0x135   : > { %776 = vmatpush1.msra.mxu0 %v455_v35  ;;  %v598_v35 = vrot.slane %v589_v1, %v2061_v15 }
 0x136   : > { %777 = vmatprep.subr.mxu0 %v450_v36 }
 0x137   : > { %778 = vmatpush1.msra.mxu0 %v449_v37 }
 0x138   : > { %779 = vmatprep.subr.mxu0 %v444_v38 }
 0x139   : > { %780 = vmatpush1.msra.mxu0 %v443_v39 }
 0x13a   : > { %781 = vmatprep.subr.mxu0 %v438_v40 }
 0x13b   : > { %782 = vmatpush1.msra.mxu0 %v437_v41  ;;  %v609_v41 = vsub.s32 4, %v2058_v14 }
 0x13c   : > { %783 = vmatprep.subr.mxu0 %v432_v42  ;;  %v613_v42 = vsub.s32 5, %v2058_v14 }
 0x13d   : > { %784 = vmatpush1.msra.mxu0 %v431_v43  ;;  %v610_v43 = vrot.slane %v589_v1, %v609_v41  ;;  %v1162_v41 = vld [vmem:[#allocation10 + $0x38] sm:$0xff] }
 0x13e   : > { %785 = vmatprep.subr.mxu0 %v426_v44  ;;  %v614_v44 = vrot.slane %v589_v1, %v613_v42  ;;  %v1161_v42 = vld [vmem:[#allocation10 + $0x30] sm:$0xff] }
 0x13f   : > { %786 = vmatpush1.msra.mxu0 %v425_v45 }
 0x140   : > { %787 = vmatprep.subr.mxu0 %v420_v46 }
 0x141   : > { %788 = vmatpush1.msra.mxu0 %v419_v47 }
 0x142   : > { %789 = vmatprep.subr.mxu0 %v414_v48 }
 0x143   : > { %790 = vmatpush1.msra.mxu0 %v413_v49  ;;  %v834_v49 = vld [vmem:[%s323_s2] sm:$0x1]  ;;  %s1733_s2 = scalar_lea.vmem %s1732_s10, 512 }
 0x144   : > { %791 = vmatprep.subr.mxu0 %v408_v50  ;;  %vm906_vm1 = vcmp.eq.s32.totalorder %v834_v49, 0  ;;  %v1816_v50 = vmov 0   ;;  %v1218_v49 = vld [vmem:[#allocation10 + $0x1f8] sm:$0xff]  ;;  %p1735_p3 = scmp.lt.s32.totalorder %s1733_s2, %s1727_s13 }
 0x145   : > { %792 = vmatpush1.msra.mxu0 %v407_v51  ;;  %v907_v51 = vsel %vm906_vm1, 1, %v1816_v50  ;;  %v1217_v50 = vld [vmem:[#allocation10 + $0x1f0] sm:$0xff] }
 0x146   : > { %793 = vmatprep.subr.mxu0 %v402_v52  ;;  %v911_v52 = vrot.slane %v907_v51, %v2064_v16  ;;  %v1216_v51 = vld [vmem:[#allocation10 + $0x1e8] sm:$0xff]  ;;  %p1736_p9 = por %p1735_p3, %p1734_p1 }
 0x147   : > { %794 = vmatpush1.msra.mxu0 %v401_v53 }
 0x148   : > { %795 = vmatprep.subr.mxu0 %v588_v54  ;;  %vm912_vm2 = vcmp.eq.s32.totalorder %v911_v52, 1  ;;  %v1215_v52 = vld [vmem:[#allocation10 + $0x1e0] sm:$0xff]  ;;  %p1737_p5 = pnand %p1736_p9, %p1730_p0 }
 0x149   : > { %796 = vmatpush2.msra.mxu0 %v587_v55 }
 0x14a   : > { %797 = vmatprep.subr.mxu0 %v582_v56 }
 0x14b   : > { %798 = vmatpush2.msra.mxu0 %v581_v57 }
 0x14c   : > { %799 = vmatprep.subr.mxu0 %v576_v58 }
 0x14d   : > { %800 = vmatpush2.msra.mxu0 %v575_v59 }
 0x14e   : > { %801 = vmatprep.subr.mxu0 %v570_v60 }
 0x14f   : > { %802 = vmatpush2.msra.mxu0 %v569_v61 }
 0x150   : > { %803 = vmatprep.subr.mxu0 %v564_v62 }
 0x151   : > { %804 = vmatpush2.msra.mxu0 %v563_v63 }
 0x152   : > { %805 = vmatprep.subr.mxu0 %v558_v2 }
 0x153   : > { %806 = vmatpush2.msra.mxu0 %v557_v3 }
 0x154   : > { %807 = vmatprep.subr.mxu0 %v552_v4 }
 0x155   : > { %808 = vmatpush2.msra.mxu0 %v551_v5 }
 0x156   : > { %809 = vmatprep.subr.mxu0 %v546_v6 }
 0x157   : > { %810 = vmatpush2.msra.mxu0 %v545_v7 }
 0x158   : > { %811 = vmatprep.subr.mxu0 %v540_v8 }
 0x159   : > { %812 = vmatpush2.msra.mxu0 %v539_v9 }
 0x15a   : > { %813 = vmatprep.subr.mxu0 %v534_v10  ;;  %v1186_v10 = vld [vmem:[#allocation10 + $0xf8] sm:$0xff] }
 0x15b   : > { %814 = vmatpush2.msra.mxu0 %v533_v11 }
 0x15c   : > { %815 = vmatprep.subr.mxu0 %v528_v12 }
 0x15d   : > { %816 = vmatpush2.msra.mxu0 %v527_v13 }
 0x15e   : > { %817 = vmatprep.subr.mxu0 %v522_v17 }
 0x15f   : > { %818 = vmatpush2.msra.mxu0 %v521_v18 }
 0x160   : > { %819 = vmatprep.subr.mxu0 %v516_v19 }
 0x161   : > { %820 = vmatpush2.msra.mxu0 %v515_v20  ;;  %v1185_v20 = vld [vmem:[#allocation10 + $0xf0] sm:$0xff] }
 0x162   : > { %821 = vmatprep.subr.mxu0 %v510_v21  ;;  %v1184_v21 = vld [vmem:[#allocation10 + $0xe8] sm:$0xff] }
 0x163   : > { %822 = vmatpush2.msra.mxu0 %v509_v22  ;;  %v1183_v22 = vld [vmem:[#allocation10 + $0xe0] sm:$0xff] }
 0x164   : > { %823 = vmatprep.subr.mxu0 %v504_v23  ;;  %v1182_v23 = vld [vmem:[#allocation10 + $0xd8] sm:$0xff] }
 0x165   : > { %824 = vmatpush2.msra.mxu0 %v503_v25  ;;  %v1181_v25 = vld [vmem:[#allocation10 + $0xd0] sm:$0xff] }
 0x166   : > { %825 = vmatprep.subr.mxu0 %v498_v26  ;;  %v1180_v26 = vld [vmem:[#allocation10 + $0xc8] sm:$0xff] }
 0x167   : > { %826 = vmatpush2.msra.mxu0 %v497_v27  ;;  %v1179_v27 = vld [vmem:[#allocation10 + $0xc0] sm:$0xff] }
 0x168   : > { %828 = vmatmul.mubr.f32.vlgmr.msra.gmra.mxu0 %v2070_v24  ;;  %1472 = vmatprep.subr.mxu0 %v1814_v28  ;;  %v594_v24 = vrot.slane %v589_v1, %v2064_v16  ;;  %v1176_v1 = vld [vmem:[#allocation10 + $0xa8] sm:$0xff] }
 0x169   : > { %1474 = vmatprep.mubr.msk.f32.mxu0 %vm1815_vm0, %v1814_v28 }
 0x1e8   : > { %v687_v32 = vpop.f32.mrf.mxu0  ;;  %v758_v33 = vpop.f32.mrf.mxu1 }
 0x1e9   : > { %v759_v34 = vadd.f32 %v758_v33, %v602_v30  ;;  %v688_v39 = vadd.f32 %v687_v32, %v594_v24  ;;  %v1174_v30 = vld [vmem:[#allocation10 + $0x98] sm:$0xff]  ;;  %v1172_v24 = vld [vmem:[#allocation10 + $0x88] sm:$0xff]  ;;  %v1171_v32 = vld [vmem:[#allocation10 + $0x80] sm:$0xff] }
 0x1ea   : > { %v760_v36 = vpop.f32.mrf.mxu1  ;;  %v689_v37 = vpop.f32.mrf.mxu0  ;;  %v1170_v33 = vld [vmem:[#allocation10 + $0x78] sm:$0xff] }
 0x1eb   : > { %v761_v38 = vadd.f32 %v760_v36, %v606_v31  ;;  %1473 = vmatpush3.xpose.msra.mxu0 %v759_v34  ;;  %v690_v40 = vadd.f32 %v689_v37, %v598_v35  ;;  %v1173_v31 = vld [vmem:[#allocation10 + $0x90] sm:$0xff]  ;;  %v1168_v35 = vld [vmem:[#allocation10 + $0x68] sm:$0xff]  ;;  %v1167_v36 = vld [vmem:[#allocation10 + $0x60] sm:$0xff] }
 0x1ec   : > { %1477 = vmatprep.subr.mxu0 %v1814_v28  ;;  %v1169_v34 = vld [vmem:[#allocation10 + $0x70] sm:$0xff]  ;;  %v1166_v37 = vld [vmem:[#allocation10 + $0x58] sm:$0xff] }
 0x1ed   : > { %1483 = vmatpush3.xpose.msra.mxu1 %v761_v38  ;;  %v1165_v38 = vld [vmem:[#allocation10 + $0x50] sm:$0xff] }
 0x1ee   : > { %1475 = vmatmul.mubr.f32.vlgmr.msra.gmra.mxu0 %v688_v39  ;;  %1487 = vmatprep.subr.mxu1 %v1814_v28  ;;  %v1164_v39 = vld [vmem:[#allocation10 + $0x48] sm:$0xff] }
 0x1ef   : > { %1479 = vmatprep.mubr.msk.f32.mxu0 %vm1815_vm0, %v1814_v28 }
 0x1f0   : > { %1485 = vmatmul.mubr.f32.vlgmr.msra.gmra.mxu1 %v690_v40  ;;  %v1163_v40 = vld [vmem:[#allocation10 + $0x40] sm:$0xff] }
 0x1f1   : > { %1489 = vmatprep.mubr.msk.f32.mxu1 %vm1815_vm0, %v1814_v28  ;;  %v1178_v28 = vld [vmem:[#allocation10 + $0xb8] sm:$0xff] }
 0x228   : > { %v829_v45 = vpop.f32.mrf.mxu0 }
 0x229   : > { %v830_v46 = vadd.f32 %v829_v45, %v610_v43  ;;  %v1160_v43 = vld [vmem:[#allocation10 + $0x28] sm:$0xff]  ;;  %v1158_v45 = vld [vmem:[#allocation10 + $0x18] sm:$0xff] }
 0x22a   : > { %v831_v47 = vpop.f32.mrf.mxu0 }
 0x22b   : > { %v832_v48 = vadd.f32 %v831_v47, %v614_v44  ;;  %1478 = vmatpush3.msra.mxu0 %v830_v46  ;;  %v1159_v44 = vld [vmem:[#allocation10 + $0x20] sm:$0xff]  ;;  %v1157_v46 = vld [vmem:[#allocation10 + $0x10] sm:$0xff]  ;;  %v1156_v47 = vld [vmem:[#allocation10 + $0x8] sm:$0xff] }
 0x22d   : > { %1488 = vmatpush3.msra.mxu1 %v832_v48  ;;  %v1155_v48 = vld [vmem:[#allocation10] sm:$0xff] }
 0x22e   : > { %1231 = vmatprep.subr.mxu1 %v1186_v10  ;;  %v1194_v10 = vld [vmem:[#allocation10 + $0x138] sm:$0xff] }
 0x2ae   : > { %v901_v53 = vpop.f32.mrf.mxu0 }
 0x2af   : > { %v905_v54 = vmul.f32 0.088388346, %v901_v53  ;;  %v1214_v53 = vld [vmem:[#allocation10 + $0x1d8] sm:$0xff] }
 0x2b0   : > { %v1476_v14 = vpop.f32.mrf.mxu0  ;;  %v1065_v55 = vpop.f32.mrf.mxu1 }
 0x2b1   : > { %v1069_v56 = vmul.f32 0.088388346, %v1065_v55  ;;  %v913_v57 = vsel %vm912_vm2, -1e+09, %v905_v54  ;;  %v1213_v54 = vld [vmem:[#allocation10 + $0x1d0] sm:$0xff]  ;;  %v1212_v14 = vld [vmem:[#allocation10 + $0x1c8] sm:$0xff] }
 0x2b2   : > { %v1486_v58 = vpop.f32.mrf.mxu1  ;;  %v915_v59 = vsel %vm914_vm3, %v913_v57, -inf  ;;  %v1211_v55 = vld [vmem:[#allocation10 + $0x1c0] sm:$0xff] }
 0x2b3   : > { %916 = vmax.xlane.f32.xlu1 %v915_v59  ;;  %v1070_v60 = vsel %vm912_vm2, -1e+09, %v1069_v56  ;;  %v1210_v56 = vld [vmem:[#allocation10 + $0x1b8] sm:$0xff]  ;;  %v1208_v58 = vld [vmem:[#allocation10 + $0x1a8] sm:$0xff]  ;;  %v1207_v59 = vld [vmem:[#allocation10 + $0x1a0] sm:$0xff] }
 0x2b4   : > { %v1071_v61 = vsel %vm914_vm3, %v1070_v60, -inf }
 0x2b5   : > { %1072 = vmax.xlane.f32.xlu0 %v1071_v61  ;;  %v1205_v61 = vld [vmem:[#allocation10 + $0x190] sm:$0xff] }
 0x33c   : > { %v917_v62 = vpop.xlane.xlu1 %916 }
 0x33d   : > { %v918_v63 = vsub.f32 %v913_v57, %v917_v62  ;;  %v1209_v57 = vld [vmem:[#allocation10 + $0x1b0] sm:$0xff]  ;;  %v1204_v62 = vld [vmem:[#allocation10 + $0x188] sm:$0xff] }
 0x33e   : > { %v1073_v2 = vpop.xlane.xlu0 %1072 }
 0x33f   : > { %v919_v3 = vmul.f32 1.442695, %v918_v63  ;;  %v1074_v4 = vsub.f32 %v1070_v60, %v1073_v2  ;;  %v1206_v60 = vld [vmem:[#allocation10 + $0x198] sm:$0xff]  ;;  %v1203_v63 = vld [vmem:[#allocation10 + $0x180] sm:$0xff] }
 0x340   : > { %v1202_v2 = vld [vmem:[#allocation10 + $0x178] sm:$0xff] }
 0x341   : > { %1583 = vpow2.f32 %v919_v3  ;;  %v1075_v5 = vmul.f32 1.442695, %v1074_v4  ;;  %v1201_v3 = vld [vmem:[#allocation10 + $0x170] sm:$0xff]  ;;  %v1200_v4 = vld [vmem:[#allocation10 + $0x168] sm:$0xff] }
 0x343   : > { %1585 = vpow2.f32 %v1075_v5  ;;  %v1199_v5 = vld [vmem:[#allocation10 + $0x160] sm:$0xff] }
 0x34e   : > { %v1584_v6 = vpop.eup %1583 }
 0x34f   : > { %v921_v7 = vsel %vm914_vm3, %v1584_v6, 0.0 }
 0x350   : > { %v1586_v8 = vpop.eup %1585  ;;  %922 = vadd.xlane.f32.xlu0 %v921_v7  ;;  %v1197_v7 = vld [vmem:[#allocation10 + $0x150] sm:$0xff] }
 0x351   : > { %v1077_v9 = vsel %vm914_vm3, %v1586_v8, 0.0 }
 0x352   : > { %1078 = vadd.xlane.f32.xlu1 %v1077_v9  ;;  %v1195_v9 = vld [vmem:[#allocation10 + $0x140] sm:$0xff] }
 0x3d9   : > { %v923_v11 = vpop.xlane.xlu0 %922 }
 0x3da   : > { %1587 = vrcp.f32 %v923_v11  ;;  %v1193_v11 = vld [vmem:[#allocation10 + $0x130] sm:$0xff] }
 0x3db   : > { %v1079_v12 = vpop.xlane.xlu1 %1078 }
 0x3dc   : > { %1589 = vrcp.f32 %v1079_v12  ;;  %v1192_v12 = vld [vmem:[#allocation10 + $0x128] sm:$0xff] }
 0x3e7   : > { %v1588_v13 = vpop.eup %1587 }
 0x3e8   : > { %v925_v17 = vmul.f32 %v1588_v13, %v1584_v6  ;;  %v1198_v6 = vld [vmem:[#allocation10 + $0x158] sm:$0xff]  ;;  %v1191_v13 = vld [vmem:[#allocation10 + $0x120] sm:$0xff] }
 0x3e9   : > { %v1590_v18 = vpop.eup %1589 }
 0x3ea   : > { %1480 = vmatmul.mubr.msk.f32.vlgmr.msra.gmra.mxu0 %vm914_vm3, %v925_v17  ;;  %v1081_v19 = vmul.f32 %v1590_v18, %v1586_v8  ;;  %v1196_v8 = vld [vmem:[#allocation10 + $0x148] sm:$0xff]  ;;  %v1190_v17 = vld [vmem:[#allocation10 + $0x118] sm:$0xff]  ;;  %v1189_v18 = vld [vmem:[#allocation10 + $0x110] sm:$0xff] }
 0x3ec   : > { %1490 = vmatmul.mubr.msk.f32.vlgmr.msra.gmra.mxu1 %vm914_vm3, %v1081_v19  ;;  %v1188_v19 = vld [vmem:[#allocation10 + $0x108] sm:$0xff] }
 0x3ed   : > { %1232 = vmatpush1.msra.mxu1 %v1185_v20  ;;  %v1187_v20 = vld [vmem:[#allocation10 + $0x100] sm:$0xff] }
 0x3ee   : > { %1233 = vmatprep.subr.mxu1 %v1184_v21 }
 0x3ef   : > { %1234 = vmatpush1.msra.mxu1 %v1183_v22 }
 0x3f0   : > { %1235 = vmatprep.subr.mxu1 %v1182_v23 }
 0x3f1   : > { %1236 = vmatpush1.msra.mxu1 %v1181_v25 }
 0x3f2   : > { %1237 = vmatprep.subr.mxu1 %v1180_v26  ;;  %v1219_v26 = vld [vmem:[%s2147_s6] sm:$0x3] }
 0x3f3   : > { %1238 = vmatpush1.msra.mxu1 %v1179_v27  ;;  %v1224_v27 = vrot.slane %v1219_v26, %v2064_v16 }
 0x3f4   : > { %1239 = vmatprep.subr.mxu1 %v1178_v28  ;;  %v1228_v28 = vrot.slane %v1219_v26, %v2061_v15 }
 0x3f5   : > { %1240 = vmatpush1.msra.mxu1 %v1177_v29 }
 0x3f6   : > { %1241 = vmatprep.subr.mxu1 %v1176_v1 }
 0x3f7   : > { %1242 = vmatpush1.msra.mxu1 %v1175_v0 }
 0x3f8   : > { %1243 = vmatprep.subr.mxu1 %v1174_v30  ;;  %v1591_v30 = vld [vmem:[%s2028_s18] sm:$0xff] }
 0x3f9   : > { %1244 = vmatpush1.msra.mxu1 %v1173_v31 }
 0x3fa   : > { %1245 = vmatprep.subr.mxu1 %v1172_v24 }
 0x3fb   : > { %1246 = vmatpush1.msra.mxu1 %v1171_v32  ;;  %v1592_v32 = vld [vmem:[%s2028_s18 + $0x8] sm:$0xff] }
 0x3fc   : > { %1247 = vmatprep.subr.mxu1 %v1170_v33 }
 0x3fd   : > { %1248 = vmatpush1.msra.mxu1 %v1169_v34 }
 0x3fe   : > { %1249 = vmatprep.subr.mxu1 %v1168_v35 }
 0x3ff   : > { %1250 = vmatpush1.msra.mxu1 %v1167_v36 }
 0x400   : > { %1251 = vmatprep.subr.mxu1 %v1166_v37 }
 0x401   : > { %1252 = vmatpush1.msra.mxu1 %v1165_v38 }
 0x402   : > { %1253 = vmatprep.subr.mxu1 %v1164_v39 }
 0x403   : > { %1254 = vmatpush1.msra.mxu1 %v1163_v40 }
 0x404   : > { %1255 = vmatprep.subr.mxu1 %v1162_v41 }
 0x405   : > { %1256 = vmatpush1.msra.mxu1 %v1161_v42 }
 0x406   : > { %1257 = vmatprep.subr.mxu1 %v1160_v43 }
 0x407   : > { %1258 = vmatpush1.msra.mxu1 %v1159_v44 }
 0x408   : > { %1259 = vmatprep.subr.mxu1 %v1158_v45 }
 0x409   : > { %1260 = vmatpush1.msra.mxu1 %v1157_v46 }
 0x40a   : > { %1261 = vmatprep.subr.mxu1 %v1156_v47 }
 0x40b   : > { %1262 = vmatpush1.msra.mxu1 %v1155_v48 }
 0x40c   : > { %1263 = vmatprep.subr.mxu1 %v1218_v49 }
 0x40d   : > { %1264 = vmatpush2.msra.mxu1 %v1217_v50 }
 0x40e   : > { %1265 = vmatprep.subr.mxu1 %v1216_v51 }
 0x40f   : > { %1266 = vmatpush2.msra.mxu1 %v1215_v52 }
 0x410   : > { %1267 = vmatprep.subr.mxu1 %v1214_v53 }
 0x411   : > { %1268 = vmatpush2.msra.mxu1 %v1213_v54 }
 0x412   : > { %1269 = vmatprep.subr.mxu1 %v1212_v14 }
 0x413   : > { %1270 = vmatpush2.msra.mxu1 %v1211_v55 }
 0x414   : > { %1271 = vmatprep.subr.mxu1 %v1210_v56 }
 0x415   : > { %1272 = vmatpush2.msra.mxu1 %v1209_v57 }
 0x416   : > { %1273 = vmatprep.subr.mxu1 %v1208_v58 }
 0x417   : > { %1274 = vmatpush2.msra.mxu1 %v1207_v59 }
 0x418   : > { %1275 = vmatprep.subr.mxu1 %v1206_v60 }
 0x419   : > { %1276 = vmatpush2.msra.mxu1 %v1205_v61 }
 0x41a   : > { %1277 = vmatprep.subr.mxu1 %v1204_v62 }
 0x41b   : > { %1278 = vmatpush2.msra.mxu1 %v1203_v63 }
 0x41c   : > { %1279 = vmatprep.subr.mxu1 %v1202_v2 }
 0x41d   : > { %1280 = vmatpush2.msra.mxu1 %v1201_v3 }
 0x41e   : > { %1281 = vmatprep.subr.mxu1 %v1200_v4 }
 0x41f   : > { %1282 = vmatpush2.msra.mxu1 %v1199_v5 }
 0x420   : > { %1283 = vmatprep.subr.mxu1 %v1198_v6 }
 0x421   : > { %1284 = vmatpush2.msra.mxu1 %v1197_v7 }
 0x422   : > { %1285 = vmatprep.subr.mxu1 %v1196_v8 }
 0x423   : > { %1286 = vmatpush2.msra.mxu1 %v1195_v9 }
 0x424   : > { %1287 = vmatprep.subr.mxu1 %v1194_v10 }
 0x425   : > { %1288 = vmatpush2.msra.mxu1 %v1193_v11 }
 0x426   : > { %1289 = vmatprep.subr.mxu1 %v1192_v12 }
 0x427   : > { %1290 = vmatpush2.msra.mxu1 %v1191_v13 }
 0x428   : > { %1291 = vmatprep.subr.mxu1 %v1190_v17 }
 0x429   : > { %1292 = vmatpush2.msra.mxu1 %v1189_v18 }
 0x42a   : > { %1293 = vmatprep.subr.mxu1 %v1188_v19 }
 0x42b   : > { %1294 = vmatpush2.msra.mxu1 %v1187_v20 }
 0x4aa   : > { %v995_v21 = vpop.f32.mrf.mxu0 }
 0x4ac   : > { %v1481_v22 = vpop.f32.mrf.mxu0  ;;  %v1151_v23 = vpop.f32.mrf.mxu1 }
 0x4ad   : > { %1295 = vmatprep.mubr.f32.mxu1 %v1151_v23 }
 0x4ae   : > { %v1491_v25 = vpop.f32.mrf.mxu1  ;;  %1296 = vmatmul.mubr.f32.vlgmr.msra.gmra.mxu1 %v995_v21 }
 0x56e   : > { %v1297_v29 = vpop.f32.mrf.mxu1 }
 0x56f   : > { %v1298_v1 = vadd.f32 %v1297_v29, %v1224_v27 }
 0x570   : > { %v1299_v0 = vpop.f32.mrf.mxu1 }
 0x571   : > { %v1302_v31 = vadd.f32 %v1591_v30, %v1298_v1  ;;  %v1300_v24 = vadd.f32 %v1299_v0, %v1228_v28 }
 0x573   : > { %1304 = vst [vmem:[%s369_s21] sm:$0xff] %v1302_v31  ;;  %v1303_v33 = vadd.f32 %v1592_v32, %v1300_v24 }
 0x575   : > { %1305 = vst [vmem:[%s369_s21 + $0x8] sm:$0xff] %v1303_v33 }
 0x576   : > { %1740 = shalt.err (!%p1737_p5)
}
 0x577   : > { %s1741_s18 = scalar_lea.hbm %s1319_s12, 256  ;;  %s1745_s15 = scalar_lea.hbm %s2148_s7, 512 }
 0x578   : > { %p1742_p4 = scmp.ne.s32.totalorder %s1319_s12, %s1741_s18  ;;  %p1746_p6 = scmp.lt.s32.totalorder %s1319_s12, %s2148_s7 }
 0x579   : > { %p1747_p8 = scmp.lt.s32.totalorder %s1745_s15, %s1741_s18 }
 0x57a   : > { %p1743_p2 = pnand %p1742_p4, %p2171_p10 }
 0x57b   : > { %p1748_p12 = por %p1747_p8, %p1746_p6 }
 0x57c   : > { %p1744_p11 = pneg %p1743_p2 }
 0x57e   : > { %p1749_p7 = pnand %p1748_p12, %p1744_p11 }
 0x580   : > { %1752 = shalt.err (!%p1749_p7)
}
 0x581   : > { %1508 = dma.vmem_to_hbm [thread:$0]  (%p2171_p10), %s1322_s23, 256, %s1319_s12, %s1307_s9  }
 0x582 PF: > { %s1333_s22 = sand.u32 1, %s1791_s24   ;;  %p2172_p13 = scmp.ne.s32.totalorder %s2156_s8, 0 }
 0x583   : > { %p2173_p0 = scmp.ge.s32.totalorder %s1803_s27, 2  ;;  %s1334_s21 = scalar_lea.sflag [#allocation4], %s1333_s22 }
 0x585   : > { %p1528_p1 = pnand %p2173_p0, %p2172_p13 }
 0x587   : > { %p1529_p3 = pneg %p1528_p1 }
 0x589   : > { %1786 = dma.done.wait (%p1529_p3), %s1334_s21, 256  }
 0x58a   : > { %1788 = vsyncadd (%p1529_p3), %s1334_s21, 4294967040  ;;  %p24_p9 = scmp.ge.s32.totalorder %s1938_s17, 4   ;;  %s2174_s24 = smov %s1795_s25 }
 0x58b   : > { %s2175_s25 = smov %s1799_s26  ;;  %s2176_s26 = smov %s1948_s20 }
 0x58c   : > { %s2177_s27 = smov %s1938_s17  ;;  %26 = sbr.rel (!%p24_p9) target bundleno = 11 (0xb), region = 118 }
 0x591   :  { %1339 = vsyncpa [#allocation3], 1 }
 0x592   :  { %1341 = vsyncpa [#allocation3 + $0x1], 1 }
 0x593   :  { %1342 = vsyncpa [#allocation6], 1 }
 0x594   :  { %1344 = vsyncpa [#allocation6 + $0x1], 1 }
 0x595   :  { %1345 = vsyncpa [#allocation9], 1 }
 0x596   :  { %1346 = vsyncpa [#allocation4], 1 }
 0x597   :  { %1348 = vsyncpa [#allocation4 + $0x1], 1 }

</bundles_post_ra>
